<compile_context>
chip_gen: v7x
topology: tpu7x:2x2x1
jax: 0.10.0
libtpu: 0.0.40
codegen_flags: <defaults>
</compile_context>

<pallas_src>
import math

import jax
import jax.numpy as jnp
from jax.experimental import pallas as pl
from jax.experimental.pallas import tpu as pltpu

# ---- small synthetic BERT config (shapes consistent with the module) ----
VOCAB = 50
TYPE_VOCAB = 2
MAX_POS = 16
HIDDEN = 32
HEADS = 2
HEAD_DIM = HIDDEN // HEADS
FFN = 64
LAYERS = 2
NUM_CLASSES = 4
LN_EPS = 1e-12
DR_RATE = 0.1          # nn.Dropout(p=dr_rate): eval-mode => identity (see kernel)
LANE = 128             # lane-dense output width

_VMEM = pl.BlockSpec(memory_space=pltpu.MemorySpace.VMEM)


# ------------------------- fused Pallas kernel -------------------------

def _bert_kernel(emb_ref, mask_ref, emb_ln_g_ref, emb_ln_b_ref,
                 wqkv_ref, bqkv_ref, wo_ref, bo_ref,
                 ln1_g_ref, ln1_b_ref, w1_ref, b1_ref, w2_ref, b2_ref,
                 ln2_g_ref, ln2_b_ref,
                 pooler_w_ref, pooler_b_ref, cls_w_ref, cls_b_ref,
                 out_ref):
    B, S = mask_ref.shape
    scale = 1.0 / math.sqrt(HEAD_DIM)

    def ln(x, g, b):
        # f32 LayerNorm over the hidden dim.
        mu = jnp.mean(x, axis=-1, keepdims=True)
        var = jnp.mean((x - mu) ** 2, axis=-1, keepdims=True)
        return (x - mu) * jax.lax.rsqrt(var + LN_EPS) * g + b

    def mm(x, w):
        # bf16 MXU matmul with f32 accumulation.
        return jnp.dot(x.astype(jnp.bfloat16), w.astype(jnp.bfloat16),
                       preferred_element_type=jnp.float32)

    add_mask = mask_ref[...]                                   # (B, S) additive (0 / -1e9)

    # Embedding LayerNorm (embedding sum is computed in the JAX wrapper;
    # the gathers themselves are data-dependent and stay outside the kernel).
    h = ln(emb_ref[...].astype(jnp.float32),
           emb_ln_g_ref[...], emb_ln_b_ref[...])               # (B*S, D)

    for l in range(LAYERS):
        # --- self-attention: fused QKV projection, per-head slices ---
        qkv = mm(h, wqkv_ref[l]) + bqkv_ref[l]                 # (B*S, 3D)
        ctx_heads = []
        for hd in range(HEADS):
            lo = hd * HEAD_DIM
            qh = qkv[:, lo:lo + HEAD_DIM].reshape(B, S, HEAD_DIM)
            kh = qkv[:, HIDDEN + lo:HIDDEN + lo + HEAD_DIM].reshape(B, S, HEAD_DIM)
            vh = qkv[:, 2 * HIDDEN + lo:2 * HIDDEN + lo + HEAD_DIM].reshape(B, S, HEAD_DIM)

            s = jnp.einsum('bqd,bkd->bqk',
                           qh.astype(jnp.bfloat16), kh.astype(jnp.bfloat16),
                           preferred_element_type=jnp.float32) * scale
            s = s + add_mask[:, None, :]                       # mask padded keys (f32)
            s = s - jnp.max(s, axis=-1, keepdims=True)
            p = jnp.exp(s)
            p = p * pl.reciprocal(jnp.sum(p, axis=-1, keepdims=True), approx=True)
            ch = jnp.einsum('bqk,bkd->bqd',
                            p.astype(jnp.bfloat16), vh.astype(jnp.bfloat16),
                            preferred_element_type=jnp.float32)  # (B, S, Dh)
            ctx_heads.append(ch.reshape(B * S, HEAD_DIM))
        ctx = jnp.concatenate(ctx_heads, axis=-1)              # (B*S, D)

        attn_out = mm(ctx, wo_ref[l]) + bo_ref[l]
        h = ln(attn_out + h, ln1_g_ref[l], ln1_b_ref[l])

        # --- feed-forward ---
        # TODO(synk): jax.nn.gelu defaults to the tanh approximation; HF BERT
        # uses exact erf GELU — swap to approximate=False for bit parity.
        ffn = jax.nn.gelu(mm(h, w1_ref[l]) + b1_ref[l])
        ffn = mm(ffn, w2_ref[l]) + b2_ref[l]
        h = ln(ffn + h, ln2_g_ref[l], ln2_b_ref[l])

    # --- pooler (tanh on [CLS] token of each batch) + classifier epilogue ---
    cls_rows = jnp.concatenate([h[b * S:b * S + 1, :] for b in range(B)], axis=0)  # (B, D)
    pooled = jnp.tanh(mm(cls_rows, pooler_w_ref[...]) + pooler_b_ref[...])

    # TODO(synk): nn.Dropout(p=dr_rate) is stochastic only in training mode;
    # eval-mode (deterministic) semantics is identity, applied here.
    logits = mm(pooled, cls_w_ref[...]) + cls_b_ref[...]       # (B, 128) lane-dense
    out_ref[...] = logits.astype(out_ref.dtype)


# ------------------------- parameters -------------------------

def init_params(key):
    keys = jax.random.split(key, 16)
    it = iter(keys)

    def w(shape):
        return (0.02 * jax.random.normal(next(it), shape)).astype(jnp.float32)

    zeros = lambda s: jnp.zeros(s, jnp.float32)
    ones = lambda s: jnp.ones(s, jnp.float32)

    return {
        "word_emb": w((VOCAB, HIDDEN)),
        "pos_emb": w((MAX_POS, HIDDEN)),
        "type_emb": w((TYPE_VOCAB, HIDDEN)),
        "emb_ln_g": ones((1, HIDDEN)), "emb_ln_b": zeros((1, HIDDEN)),
        # per-layer weights, stacked along a leading LAYERS axis
        "wqkv": w((LAYERS, HIDDEN, 3 * HIDDEN)), "bqkv": zeros((LAYERS, 1, 3 * HIDDEN)),
        "wo": w((LAYERS, HIDDEN, HIDDEN)), "bo": zeros((LAYERS, 1, HIDDEN)),
        "ln1_g": ones((LAYERS, 1, HIDDEN)), "ln1_b": zeros((LAYERS, 1, HIDDEN)),
        "w1": w((LAYERS, HIDDEN, FFN)), "b1": zeros((LAYERS, 1, FFN)),
        "w2": w((LAYERS, FFN, HIDDEN)), "b2": zeros((LAYERS, 1, HIDDEN)),
        "ln2_g": ones((LAYERS, 1, HIDDEN)), "ln2_b": zeros((LAYERS, 1, HIDDEN)),
        "pooler_w": w((HIDDEN, HIDDEN)), "pooler_b": zeros((1, HIDDEN)),
        # PyTorch Linear(hidden, num_classes), stored transposed (in, out)
        "cls_w": w((HIDDEN, NUM_CLASSES)), "cls_b": zeros((1, NUM_CLASSES)),
    }


# ------------------------- forward pass -------------------------

def gen_attention_mask(token_ids, valid_length):
    # attention_mask[i, :valid_length[i]] = 1, else 0  (float)
    B, S = token_ids.shape
    pos = jnp.arange(S, dtype=jnp.int32)[None, :]
    return (pos < valid_length[:, None]).astype(jnp.float32)


def bert_classifier_forward(params, token_ids, valid_length, segment_ids):
    B, S = token_ids.shape
    attention_mask = gen_attention_mask(token_ids, valid_length)   # (B, S)
    add_mask = (1.0 - attention_mask) * (-1e9)                     # additive key mask

    # Embedding gathers + sum stay in JAX (data-dependent gather); the
    # embedding LayerNorm and everything downstream runs in the fused kernel.
    emb = (params["word_emb"][token_ids]
           + params["pos_emb"][jnp.arange(S, dtype=jnp.int32)][None, :, :]
           + params["type_emb"][segment_ids]).reshape(B * S, HIDDEN)

    # Lane-dense classifier: pad (D, NUM_CLASSES) -> (D, 128); slice result back.
    cls_w_pad = jnp.zeros((HIDDEN, LANE), jnp.float32).at[:, :NUM_CLASSES].set(params["cls_w"])
    cls_b_pad = jnp.zeros((1, LANE), jnp.float32).at[:, :NUM_CLASSES].set(params["cls_b"])

    logits_pad = pl.pallas_call(
        _bert_kernel,
        in_specs=[_VMEM] * 20,
        out_specs=_VMEM,
        out_shape=jax.ShapeDtypeStruct((B, LANE), jnp.float32),
    )(emb, add_mask, params["emb_ln_g"], params["emb_ln_b"],
      params["wqkv"], params["bqkv"], params["wo"], params["bo"],
      params["ln1_g"], params["ln1_b"], params["w1"], params["b1"],
      params["w2"], params["b2"], params["ln2_g"], params["ln2_b"],
      params["pooler_w"], params["pooler_b"], cls_w_pad, cls_b_pad)

    return logits_pad[:, :NUM_CLASSES]


# ------------------------- main -------------------------

if __name__ == "__main__":
    key = jax.random.PRNGKey(0)
    pkey, tkey, skey = jax.random.split(key, 3)
    params = init_params(pkey)

    B, S = 2, 8
    token_ids = jax.random.randint(tkey, (B, S), 0, VOCAB, dtype=jnp.int32)
    segment_ids = jax.random.randint(skey, (B, S), 0, TYPE_VOCAB, dtype=jnp.int32)
    valid_length = jnp.array([8, 5], dtype=jnp.int32)

    logits = jax.jit(bert_classifier_forward)(params, token_ids, valid_length, segment_ids)
    jax.block_until_ready(logits)
    assert logits.shape == (B, NUM_CLASSES)
    assert bool(jnp.all(jnp.isfinite(logits)))
    print("KERNEL_OK")
</pallas_src>

<mosaic_0001>
module attributes {stable_mosaic.version = 11 : i64} {
  func.func @_bert_kernel(%arg0: memref<16x32xf32, #tpu.memory_space<vmem>>, %arg1: memref<2x8xf32, #tpu.memory_space<vmem>>, %arg2: memref<1x32xf32, #tpu.memory_space<vmem>>, %arg3: memref<1x32xf32, #tpu.memory_space<vmem>>, %arg4: memref<2x32x96xf32, #tpu.memory_space<vmem>>, %arg5: memref<2x1x96xf32, #tpu.memory_space<vmem>>, %arg6: memref<2x32x32xf32, #tpu.memory_space<vmem>>, %arg7: memref<2x1x32xf32, #tpu.memory_space<vmem>>, %arg8: memref<2x1x32xf32, #tpu.memory_space<vmem>>, %arg9: memref<2x1x32xf32, #tpu.memory_space<vmem>>, %arg10: memref<2x32x64xf32, #tpu.memory_space<vmem>>, %arg11: memref<2x1x64xf32, #tpu.memory_space<vmem>>, %arg12: memref<2x64x32xf32, #tpu.memory_space<vmem>>, %arg13: memref<2x1x32xf32, #tpu.memory_space<vmem>>, %arg14: memref<2x1x32xf32, #tpu.memory_space<vmem>>, %arg15: memref<2x1x32xf32, #tpu.memory_space<vmem>>, %arg16: memref<32x32xf32, #tpu.memory_space<vmem>>, %arg17: memref<1x32xf32, #tpu.memory_space<vmem>>, %arg18: memref<32x128xf32, #tpu.memory_space<vmem>>, %arg19: memref<1x128xf32, #tpu.memory_space<vmem>>, %arg20: memref<2x128xf32, #tpu.memory_space<vmem>>) attributes {dimension_semantics = [], scalar_prefetch = 0 : i64, scratch_operands = 0 : i64, tpu.core_type = #tpu.core_type<tc>} {
    %c0 = arith.constant 0 : index
    %c0_0 = arith.constant 0 : index
    %0 = vector.load %arg1[%c0, %c0_0] : memref<2x8xf32, #tpu.memory_space<vmem>>, vector<2x8xf32>
    %c0_1 = arith.constant 0 : index
    %c0_2 = arith.constant 0 : index
    %1 = vector.load %arg0[%c0_1, %c0_2] : memref<16x32xf32, #tpu.memory_space<vmem>>, vector<16x32xf32>
    %c0_3 = arith.constant 0 : index
    %c0_4 = arith.constant 0 : index
    %2 = vector.load %arg2[%c0_3, %c0_4] : memref<1x32xf32, #tpu.memory_space<vmem>>, vector<1x32xf32>
    %c0_5 = arith.constant 0 : index
    %c0_6 = arith.constant 0 : index
    %3 = vector.load %arg3[%c0_5, %c0_6] : memref<1x32xf32, #tpu.memory_space<vmem>>, vector<1x32xf32>
    %cst = arith.constant dense<0.000000e+00> : vector<16xf32>
    %4 = vector.multi_reduction <add>, %1, %cst [1] : vector<16x32xf32> to vector<16xf32>
    %5 = vector.shape_cast %4 : vector<16xf32> to vector<16x1xf32>
    %cst_7 = arith.constant 3.200000e+01 : f32
    %6 = vector.broadcast %cst_7 : f32 to vector<16x1xf32>
    %7 = arith.divf %5, %6 : vector<16x1xf32>
    %8 = vector.broadcast %7 : vector<16x1xf32> to vector<16x32xf32>
    %9 = arith.subf %1, %8 : vector<16x32xf32>
    %10 = arith.mulf %9, %9 : vector<16x32xf32>
    %cst_8 = arith.constant dense<0.000000e+00> : vector<16xf32>
    %11 = vector.multi_reduction <add>, %10, %cst_8 [1] : vector<16x32xf32> to vector<16xf32>
    %12 = vector.shape_cast %11 : vector<16xf32> to vector<16x1xf32>
    %cst_9 = arith.constant 3.200000e+01 : f32
    %13 = vector.broadcast %cst_9 : f32 to vector<16x1xf32>
    %14 = arith.divf %12, %13 : vector<16x1xf32>
    %15 = vector.broadcast %7 : vector<16x1xf32> to vector<16x32xf32>
    %16 = arith.subf %1, %15 : vector<16x32xf32>
    %cst_10 = arith.constant 9.99999996E-13 : f32
    %17 = vector.broadcast %cst_10 : f32 to vector<16x1xf32>
    %18 = arith.addf %14, %17 : vector<16x1xf32>
    %19 = math.rsqrt %18 : vector<16x1xf32>
    %20 = vector.broadcast %19 : vector<16x1xf32> to vector<16x32xf32>
    %21 = arith.mulf %16, %20 : vector<16x32xf32>
    %22 = vector.broadcast %2 : vector<1x32xf32> to vector<16x32xf32>
    %23 = arith.mulf %21, %22 : vector<16x32xf32>
    %24 = vector.broadcast %3 : vector<1x32xf32> to vector<16x32xf32>
    %25 = arith.addf %23, %24 : vector<16x32xf32>
    %c0_11 = arith.constant 0 : index
    %c0_12 = arith.constant 0 : index
    %c0_13 = arith.constant 0 : index
    %26 = vector.load %arg4[%c0_11, %c0_12, %c0_13] : memref<2x32x96xf32, #tpu.memory_space<vmem>>, vector<1x32x96xf32>
    %27 = vector.shape_cast %26 : vector<1x32x96xf32> to vector<32x96xf32>
    %28 = arith.truncf %25 : vector<16x32xf32> to vector<16x32xbf16>
    %29 = arith.truncf %27 : vector<32x96xf32> to vector<32x96xbf16>
    %cst_14 = arith.constant dense<0.000000e+00> : vector<16x96xf32>
    %30 = tpu.matmul %28, %29, %cst_14 {dimension_numbers = #tpu.dot_dimension_numbers<[1], [0], [0], [1], [0, 0, 1, 1], [], []>} : vector<16x32xbf16>, vector<32x96xbf16>, vector<16x96xf32> -> vector<16x96xf32>
    %c0_15 = arith.constant 0 : index
    %c0_16 = arith.constant 0 : index
    %c0_17 = arith.constant 0 : index
    %31 = vector.load %arg5[%c0_15, %c0_16, %c0_17] : memref<2x1x96xf32, #tpu.memory_space<vmem>>, vector<1x1x96xf32>
    %32 = vector.shape_cast %31 : vector<1x1x96xf32> to vector<1x96xf32>
    %33 = vector.broadcast %32 : vector<1x96xf32> to vector<16x96xf32>
    %34 = arith.addf %30, %33 : vector<16x96xf32>
    %35 = vector.extract_strided_slice %34 {offsets = [0, 0], sizes = [16, 16], strides = [1, 1]} : vector<16x96xf32> to vector<16x16xf32>
    %36 = vector.shape_cast %35 : vector<16x16xf32> to vector<2x8x16xf32>
    %37 = vector.extract_strided_slice %34 {offsets = [0, 32], sizes = [16, 16], strides = [1, 1]} : vector<16x96xf32> to vector<16x16xf32>
    %38 = vector.shape_cast %37 : vector<16x16xf32> to vector<2x8x16xf32>
    %39 = vector.extract_strided_slice %34 {offsets = [0, 64], sizes = [16, 16], strides = [1, 1]} : vector<16x96xf32> to vector<16x16xf32>
    %40 = vector.shape_cast %39 : vector<16x16xf32> to vector<2x8x16xf32>
    %41 = arith.truncf %36 : vector<2x8x16xf32> to vector<2x8x16xbf16>
    %42 = arith.truncf %38 : vector<2x8x16xf32> to vector<2x8x16xbf16>
    "tpu.trace_start"() <{level = 10 : i32, message = "bqd,bkd->bqk"}> : () -> ()
    %cst_18 = arith.constant dense<0.000000e+00> : vector<2x8x8xf32>
    %43 = tpu.matmul %41, %42, %cst_18 {dimension_numbers = #tpu.dot_dimension_numbers<[2], [2], [1], [1], [0, 0, 0, 1, 1, 1], [0], [0]>} : vector<2x8x16xbf16>, vector<2x8x16xbf16>, vector<2x8x8xf32> -> vector<2x8x8xf32>
    "tpu.trace_stop"() : () -> ()
    %cst_19 = arith.constant 2.500000e-01 : f32
    %44 = vector.broadcast %cst_19 : f32 to vector<2x8x8xf32>
    %45 = arith.mulf %43, %44 : vector<2x8x8xf32>
    %46 = vector.shape_cast %0 : vector<2x8xf32> to vector<2x1x8xf32>
    %47 = vector.broadcast %46 : vector<2x1x8xf32> to vector<2x8x8xf32>
    %48 = arith.addf %45, %47 : vector<2x8x8xf32>
    %cst_20 = arith.constant dense<0xFF800000> : vector<2x8xf32>
    %49 = vector.multi_reduction <maximumf>, %48, %cst_20 [2] : vector<2x8x8xf32> to vector<2x8xf32>
    %50 = vector.shape_cast %49 : vector<2x8xf32> to vector<2x8x1xf32>
    %51 = vector.broadcast %50 : vector<2x8x1xf32> to vector<2x8x8xf32>
    %52 = arith.subf %48, %51 : vector<2x8x8xf32>
    %53 = math.exp %52 : vector<2x8x8xf32>
    %cst_21 = arith.constant dense<0.000000e+00> : vector<2x8xf32>
    %54 = vector.multi_reduction <add>, %53, %cst_21 [2] : vector<2x8x8xf32> to vector<2x8xf32>
    %55 = vector.shape_cast %54 : vector<2x8xf32> to vector<2x8x1xf32>
    %56 = tpu.reciprocal %55 {approx = true} : vector<2x8x1xf32> -> vector<2x8x1xf32>
    %57 = vector.broadcast %56 : vector<2x8x1xf32> to vector<2x8x8xf32>
    %58 = arith.mulf %53, %57 : vector<2x8x8xf32>
    %59 = arith.truncf %58 : vector<2x8x8xf32> to vector<2x8x8xbf16>
    %60 = arith.truncf %40 : vector<2x8x16xf32> to vector<2x8x16xbf16>
    "tpu.trace_start"() <{level = 10 : i32, message = "bqk,bkd->bqd"}> : () -> ()
    %cst_22 = arith.constant dense<0.000000e+00> : vector<2x8x16xf32>
    %61 = tpu.matmul %59, %60, %cst_22 {dimension_numbers = #tpu.dot_dimension_numbers<[2], [1], [1], [2], [0, 0, 0, 1, 1, 2], [0], [0]>} : vector<2x8x8xbf16>, vector<2x8x16xbf16>, vector<2x8x16xf32> -> vector<2x8x16xf32>
    "tpu.trace_stop"() : () -> ()
    %62 = vector.shape_cast %61 : vector<2x8x16xf32> to vector<16x16xf32>
    %63 = vector.extract_strided_slice %34 {offsets = [0, 16], sizes = [16, 16], strides = [1, 1]} : vector<16x96xf32> to vector<16x16xf32>
    %64 = vector.shape_cast %63 : vector<16x16xf32> to vector<2x8x16xf32>
    %65 = vector.extract_strided_slice %34 {offsets = [0, 48], sizes = [16, 16], strides = [1, 1]} : vector<16x96xf32> to vector<16x16xf32>
    %66 = vector.shape_cast %65 : vector<16x16xf32> to vector<2x8x16xf32>
    %67 = vector.extract_strided_slice %34 {offsets = [0, 80], sizes = [16, 16], strides = [1, 1]} : vector<16x96xf32> to vector<16x16xf32>
    %68 = vector.shape_cast %67 : vector<16x16xf32> to vector<2x8x16xf32>
    %69 = arith.truncf %64 : vector<2x8x16xf32> to vector<2x8x16xbf16>
    %70 = arith.truncf %66 : vector<2x8x16xf32> to vector<2x8x16xbf16>
    "tpu.trace_start"() <{level = 10 : i32, message = "bqd,bkd->bqk"}> : () -> ()
    %cst_23 = arith.constant dense<0.000000e+00> : vector<2x8x8xf32>
    %71 = tpu.matmul %69, %70, %cst_23 {dimension_numbers = #tpu.dot_dimension_numbers<[2], [2], [1], [1], [0, 0, 0, 1, 1, 1], [0], [0]>} : vector<2x8x16xbf16>, vector<2x8x16xbf16>, vector<2x8x8xf32> -> vector<2x8x8xf32>
    "tpu.trace_stop"() : () -> ()
    %cst_24 = arith.constant 2.500000e-01 : f32
    %72 = vector.broadcast %cst_24 : f32 to vector<2x8x8xf32>
    %73 = arith.mulf %71, %72 : vector<2x8x8xf32>
    %74 = vector.shape_cast %0 : vector<2x8xf32> to vector<2x1x8xf32>
    %75 = vector.broadcast %74 : vector<2x1x8xf32> to vector<2x8x8xf32>
    %76 = arith.addf %73, %75 : vector<2x8x8xf32>
    %cst_25 = arith.constant dense<0xFF800000> : vector<2x8xf32>
    %77 = vector.multi_reduction <maximumf>, %76, %cst_25 [2] : vector<2x8x8xf32> to vector<2x8xf32>
    %78 = vector.shape_cast %77 : vector<2x8xf32> to vector<2x8x1xf32>
    %79 = vector.broadcast %78 : vector<2x8x1xf32> to vector<2x8x8xf32>
    %80 = arith.subf %76, %79 : vector<2x8x8xf32>
    %81 = math.exp %80 : vector<2x8x8xf32>
    %cst_26 = arith.constant dense<0.000000e+00> : vector<2x8xf32>
    %82 = vector.multi_reduction <add>, %81, %cst_26 [2] : vector<2x8x8xf32> to vector<2x8xf32>
    %83 = vector.shape_cast %82 : vector<2x8xf32> to vector<2x8x1xf32>
    %84 = tpu.reciprocal %83 {approx = true} : vector<2x8x1xf32> -> vector<2x8x1xf32>
    %85 = vector.broadcast %84 : vector<2x8x1xf32> to vector<2x8x8xf32>
    %86 = arith.mulf %81, %85 : vector<2x8x8xf32>
    %87 = arith.truncf %86 : vector<2x8x8xf32> to vector<2x8x8xbf16>
    %88 = arith.truncf %68 : vector<2x8x16xf32> to vector<2x8x16xbf16>
    "tpu.trace_start"() <{level = 10 : i32, message = "bqk,bkd->bqd"}> : () -> ()
    %cst_27 = arith.constant dense<0.000000e+00> : vector<2x8x16xf32>
    %89 = tpu.matmul %87, %88, %cst_27 {dimension_numbers = #tpu.dot_dimension_numbers<[2], [1], [1], [2], [0, 0, 0, 1, 1, 2], [0], [0]>} : vector<2x8x8xbf16>, vector<2x8x16xbf16>, vector<2x8x16xf32> -> vector<2x8x16xf32>
    "tpu.trace_stop"() : () -> ()
    %90 = vector.shape_cast %89 : vector<2x8x16xf32> to vector<16x16xf32>
    %91 = tpu.concatenate %62, %90 in 1 : vector<16x16xf32>, vector<16x16xf32> -> vector<16x32xf32>
    %c0_28 = arith.constant 0 : index
    %c0_29 = arith.constant 0 : index
    %c0_30 = arith.constant 0 : index
    %92 = vector.load %arg6[%c0_28, %c0_29, %c0_30] : memref<2x32x32xf32, #tpu.memory_space<vmem>>, vector<1x32x32xf32>
    %93 = vector.shape_cast %92 : vector<1x32x32xf32> to vector<32x32xf32>
    %94 = arith.truncf %91 : vector<16x32xf32> to vector<16x32xbf16>
    %95 = arith.truncf %93 : vector<32x32xf32> to vector<32x32xbf16>
    %cst_31 = arith.constant dense<0.000000e+00> : vector<16x32xf32>
    %96 = tpu.matmul %94, %95, %cst_31 {dimension_numbers = #tpu.dot_dimension_numbers<[1], [0], [0], [1], [0, 0, 1, 1], [], []>} : vector<16x32xbf16>, vector<32x32xbf16>, vector<16x32xf32> -> vector<16x32xf32>
    %c0_32 = arith.constant 0 : index
    %c0_33 = arith.constant 0 : index
    %c0_34 = arith.constant 0 : index
    %97 = vector.load %arg7[%c0_32, %c0_33, %c0_34] : memref<2x1x32xf32, #tpu.memory_space<vmem>>, vector<1x1x32xf32>
    %98 = vector.shape_cast %97 : vector<1x1x32xf32> to vector<1x32xf32>
    %99 = vector.broadcast %98 : vector<1x32xf32> to vector<16x32xf32>
    %100 = arith.addf %96, %99 : vector<16x32xf32>
    %101 = arith.addf %100, %25 : vector<16x32xf32>
    %c0_35 = arith.constant 0 : index
    %c0_36 = arith.constant 0 : index
    %c0_37 = arith.constant 0 : index
    %102 = vector.load %arg8[%c0_35, %c0_36, %c0_37] : memref<2x1x32xf32, #tpu.memory_space<vmem>>, vector<1x1x32xf32>
    %103 = vector.shape_cast %102 : vector<1x1x32xf32> to vector<1x32xf32>
    %c0_38 = arith.constant 0 : index
    %c0_39 = arith.constant 0 : index
    %c0_40 = arith.constant 0 : index
    %104 = vector.load %arg9[%c0_38, %c0_39, %c0_40] : memref<2x1x32xf32, #tpu.memory_space<vmem>>, vector<1x1x32xf32>
    %105 = vector.shape_cast %104 : vector<1x1x32xf32> to vector<1x32xf32>
    %cst_41 = arith.constant dense<0.000000e+00> : vector<16xf32>
    %106 = vector.multi_reduction <add>, %101, %cst_41 [1] : vector<16x32xf32> to vector<16xf32>
    %107 = vector.shape_cast %106 : vector<16xf32> to vector<16x1xf32>
    %cst_42 = arith.constant 3.200000e+01 : f32
    %108 = vector.broadcast %cst_42 : f32 to vector<16x1xf32>
    %109 = arith.divf %107, %108 : vector<16x1xf32>
    %110 = vector.broadcast %109 : vector<16x1xf32> to vector<16x32xf32>
    %111 = arith.subf %101, %110 : vector<16x32xf32>
    %112 = arith.mulf %111, %111 : vector<16x32xf32>
    %cst_43 = arith.constant dense<0.000000e+00> : vector<16xf32>
    %113 = vector.multi_reduction <add>, %112, %cst_43 [1] : vector<16x32xf32> to vector<16xf32>
    %114 = vector.shape_cast %113 : vector<16xf32> to vector<16x1xf32>
    %cst_44 = arith.constant 3.200000e+01 : f32
    %115 = vector.broadcast %cst_44 : f32 to vector<16x1xf32>
    %116 = arith.divf %114, %115 : vector<16x1xf32>
    %117 = vector.broadcast %109 : vector<16x1xf32> to vector<16x32xf32>
    %118 = arith.subf %101, %117 : vector<16x32xf32>
    %cst_45 = arith.constant 9.99999996E-13 : f32
    %119 = vector.broadcast %cst_45 : f32 to vector<16x1xf32>
    %120 = arith.addf %116, %119 : vector<16x1xf32>
    %121 = math.rsqrt %120 : vector<16x1xf32>
    %122 = vector.broadcast %121 : vector<16x1xf32> to vector<16x32xf32>
    %123 = arith.mulf %118, %122 : vector<16x32xf32>
    %124 = vector.broadcast %103 : vector<1x32xf32> to vector<16x32xf32>
    %125 = arith.mulf %123, %124 : vector<16x32xf32>
    %126 = vector.broadcast %105 : vector<1x32xf32> to vector<16x32xf32>
    %127 = arith.addf %125, %126 : vector<16x32xf32>
    %c0_46 = arith.constant 0 : index
    %c0_47 = arith.constant 0 : index
    %c0_48 = arith.constant 0 : index
    %128 = vector.load %arg10[%c0_46, %c0_47, %c0_48] : memref<2x32x64xf32, #tpu.memory_space<vmem>>, vector<1x32x64xf32>
    %129 = vector.shape_cast %128 : vector<1x32x64xf32> to vector<32x64xf32>
    %130 = arith.truncf %127 : vector<16x32xf32> to vector<16x32xbf16>
    %131 = arith.truncf %129 : vector<32x64xf32> to vector<32x64xbf16>
    %cst_49 = arith.constant dense<0.000000e+00> : vector<16x64xf32>
    %132 = tpu.matmul %130, %131, %cst_49 {dimension_numbers = #tpu.dot_dimension_numbers<[1], [0], [0], [1], [0, 0, 1, 1], [], []>} : vector<16x32xbf16>, vector<32x64xbf16>, vector<16x64xf32> -> vector<16x64xf32>
    %c0_50 = arith.constant 0 : index
    %c0_51 = arith.constant 0 : index
    %c0_52 = arith.constant 0 : index
    %133 = vector.load %arg11[%c0_50, %c0_51, %c0_52] : memref<2x1x64xf32, #tpu.memory_space<vmem>>, vector<1x1x64xf32>
    %134 = vector.shape_cast %133 : vector<1x1x64xf32> to vector<1x64xf32>
    %135 = vector.broadcast %134 : vector<1x64xf32> to vector<16x64xf32>
    %136 = arith.addf %132, %135 : vector<16x64xf32>
    %137 = arith.mulf %136, %136 : vector<16x64xf32>
    %138 = arith.mulf %136, %137 : vector<16x64xf32>
    %cst_53 = arith.constant 4.471500e-02 : f32
    %139 = vector.broadcast %cst_53 : f32 to vector<16x64xf32>
    %140 = arith.mulf %139, %138 : vector<16x64xf32>
    %141 = arith.addf %136, %140 : vector<16x64xf32>
    %cst_54 = arith.constant 0.797884583 : f32
    %142 = vector.broadcast %cst_54 : f32 to vector<16x64xf32>
    %143 = arith.mulf %142, %141 : vector<16x64xf32>
    %144 = math.tanh %143 : vector<16x64xf32>
    %cst_55 = arith.constant 1.000000e+00 : f32
    %145 = vector.broadcast %cst_55 : f32 to vector<16x64xf32>
    %146 = arith.addf %145, %144 : vector<16x64xf32>
    %cst_56 = arith.constant 5.000000e-01 : f32
    %147 = vector.broadcast %cst_56 : f32 to vector<16x64xf32>
    %148 = arith.mulf %147, %146 : vector<16x64xf32>
    %149 = arith.mulf %136, %148 : vector<16x64xf32>
    %c0_57 = arith.constant 0 : index
    %c0_58 = arith.constant 0 : index
    %c0_59 = arith.constant 0 : index
    %150 = vector.load %arg12[%c0_57, %c0_58, %c0_59] : memref<2x64x32xf32, #tpu.memory_space<vmem>>, vector<1x64x32xf32>
    %151 = vector.shape_cast %150 : vector<1x64x32xf32> to vector<64x32xf32>
    %152 = arith.truncf %149 : vector<16x64xf32> to vector<16x64xbf16>
    %153 = arith.truncf %151 : vector<64x32xf32> to vector<64x32xbf16>
    %cst_60 = arith.constant dense<0.000000e+00> : vector<16x32xf32>
    %154 = tpu.matmul %152, %153, %cst_60 {dimension_numbers = #tpu.dot_dimension_numbers<[1], [0], [0], [1], [0, 0, 1, 1], [], []>} : vector<16x64xbf16>, vector<64x32xbf16>, vector<16x32xf32> -> vector<16x32xf32>
    %c0_61 = arith.constant 0 : index
    %c0_62 = arith.constant 0 : index
    %c0_63 = arith.constant 0 : index
    %155 = vector.load %arg13[%c0_61, %c0_62, %c0_63] : memref<2x1x32xf32, #tpu.memory_space<vmem>>, vector<1x1x32xf32>
    %156 = vector.shape_cast %155 : vector<1x1x32xf32> to vector<1x32xf32>
    %157 = vector.broadcast %156 : vector<1x32xf32> to vector<16x32xf32>
    %158 = arith.addf %154, %157 : vector<16x32xf32>
    %159 = arith.addf %158, %127 : vector<16x32xf32>
    %c0_64 = arith.constant 0 : index
    %c0_65 = arith.constant 0 : index
    %c0_66 = arith.constant 0 : index
    %160 = vector.load %arg14[%c0_64, %c0_65, %c0_66] : memref<2x1x32xf32, #tpu.memory_space<vmem>>, vector<1x1x32xf32>
    %161 = vector.shape_cast %160 : vector<1x1x32xf32> to vector<1x32xf32>
    %c0_67 = arith.constant 0 : index
    %c0_68 = arith.constant 0 : index
    %c0_69 = arith.constant 0 : index
    %162 = vector.load %arg15[%c0_67, %c0_68, %c0_69] : memref<2x1x32xf32, #tpu.memory_space<vmem>>, vector<1x1x32xf32>
    %163 = vector.shape_cast %162 : vector<1x1x32xf32> to vector<1x32xf32>
    %cst_70 = arith.constant dense<0.000000e+00> : vector<16xf32>
    %164 = vector.multi_reduction <add>, %159, %cst_70 [1] : vector<16x32xf32> to vector<16xf32>
    %165 = vector.shape_cast %164 : vector<16xf32> to vector<16x1xf32>
    %cst_71 = arith.constant 3.200000e+01 : f32
    %166 = vector.broadcast %cst_71 : f32 to vector<16x1xf32>
    %167 = arith.divf %165, %166 : vector<16x1xf32>
    %168 = vector.broadcast %167 : vector<16x1xf32> to vector<16x32xf32>
    %169 = arith.subf %159, %168 : vector<16x32xf32>
    %170 = arith.mulf %169, %169 : vector<16x32xf32>
    %cst_72 = arith.constant dense<0.000000e+00> : vector<16xf32>
    %171 = vector.multi_reduction <add>, %170, %cst_72 [1] : vector<16x32xf32> to vector<16xf32>
    %172 = vector.shape_cast %171 : vector<16xf32> to vector<16x1xf32>
    %cst_73 = arith.constant 3.200000e+01 : f32
    %173 = vector.broadcast %cst_73 : f32 to vector<16x1xf32>
    %174 = arith.divf %172, %173 : vector<16x1xf32>
    %175 = vector.broadcast %167 : vector<16x1xf32> to vector<16x32xf32>
    %176 = arith.subf %159, %175 : vector<16x32xf32>
    %cst_74 = arith.constant 9.99999996E-13 : f32
    %177 = vector.broadcast %cst_74 : f32 to vector<16x1xf32>
    %178 = arith.addf %174, %177 : vector<16x1xf32>
    %179 = math.rsqrt %178 : vector<16x1xf32>
    %180 = vector.broadcast %179 : vector<16x1xf32> to vector<16x32xf32>
    %181 = arith.mulf %176, %180 : vector<16x32xf32>
    %182 = vector.broadcast %161 : vector<1x32xf32> to vector<16x32xf32>
    %183 = arith.mulf %181, %182 : vector<16x32xf32>
    %184 = vector.broadcast %163 : vector<1x32xf32> to vector<16x32xf32>
    %185 = arith.addf %183, %184 : vector<16x32xf32>
    %c1 = arith.constant 1 : index
    %c0_75 = arith.constant 0 : index
    %c0_76 = arith.constant 0 : index
    %186 = vector.load %arg4[%c1, %c0_75, %c0_76] : memref<2x32x96xf32, #tpu.memory_space<vmem>>, vector<1x32x96xf32>
    %187 = vector.shape_cast %186 : vector<1x32x96xf32> to vector<32x96xf32>
    %188 = arith.truncf %185 : vector<16x32xf32> to vector<16x32xbf16>
    %189 = arith.truncf %187 : vector<32x96xf32> to vector<32x96xbf16>
    %cst_77 = arith.constant dense<0.000000e+00> : vector<16x96xf32>
    %190 = tpu.matmul %188, %189, %cst_77 {dimension_numbers = #tpu.dot_dimension_numbers<[1], [0], [0], [1], [0, 0, 1, 1], [], []>} : vector<16x32xbf16>, vector<32x96xbf16>, vector<16x96xf32> -> vector<16x96xf32>
    %c1_78 = arith.constant 1 : index
    %c0_79 = arith.constant 0 : index
    %c0_80 = arith.constant 0 : index
    %191 = vector.load %arg5[%c1_78, %c0_79, %c0_80] : memref<2x1x96xf32, #tpu.memory_space<vmem>>, vector<1x1x96xf32>
    %192 = vector.shape_cast %191 : vector<1x1x96xf32> to vector<1x96xf32>
    %193 = vector.broadcast %192 : vector<1x96xf32> to vector<16x96xf32>
    %194 = arith.addf %190, %193 : vector<16x96xf32>
    %195 = vector.extract_strided_slice %194 {offsets = [0, 0], sizes = [16, 16], strides = [1, 1]} : vector<16x96xf32> to vector<16x16xf32>
    %196 = vector.shape_cast %195 : vector<16x16xf32> to vector<2x8x16xf32>
    %197 = vector.extract_strided_slice %194 {offsets = [0, 32], sizes = [16, 16], strides = [1, 1]} : vector<16x96xf32> to vector<16x16xf32>
    %198 = vector.shape_cast %197 : vector<16x16xf32> to vector<2x8x16xf32>
    %199 = vector.extract_strided_slice %194 {offsets = [0, 64], sizes = [16, 16], strides = [1, 1]} : vector<16x96xf32> to vector<16x16xf32>
    %200 = vector.shape_cast %199 : vector<16x16xf32> to vector<2x8x16xf32>
    %201 = arith.truncf %196 : vector<2x8x16xf32> to vector<2x8x16xbf16>
    %202 = arith.truncf %198 : vector<2x8x16xf32> to vector<2x8x16xbf16>
    "tpu.trace_start"() <{level = 10 : i32, message = "bqd,bkd->bqk"}> : () -> ()
    %cst_81 = arith.constant dense<0.000000e+00> : vector<2x8x8xf32>
    %203 = tpu.matmul %201, %202, %cst_81 {dimension_numbers = #tpu.dot_dimension_numbers<[2], [2], [1], [1], [0, 0, 0, 1, 1, 1], [0], [0]>} : vector<2x8x16xbf16>, vector<2x8x16xbf16>, vector<2x8x8xf32> -> vector<2x8x8xf32>
    "tpu.trace_stop"() : () -> ()
    %cst_82 = arith.constant 2.500000e-01 : f32
    %204 = vector.broadcast %cst_82 : f32 to vector<2x8x8xf32>
    %205 = arith.mulf %203, %204 : vector<2x8x8xf32>
    %206 = vector.shape_cast %0 : vector<2x8xf32> to vector<2x1x8xf32>
    %207 = vector.broadcast %206 : vector<2x1x8xf32> to vector<2x8x8xf32>
    %208 = arith.addf %205, %207 : vector<2x8x8xf32>
    %cst_83 = arith.constant dense<0xFF800000> : vector<2x8xf32>
    %209 = vector.multi_reduction <maximumf>, %208, %cst_83 [2] : vector<2x8x8xf32> to vector<2x8xf32>
    %210 = vector.shape_cast %209 : vector<2x8xf32> to vector<2x8x1xf32>
    %211 = vector.broadcast %210 : vector<2x8x1xf32> to vector<2x8x8xf32>
    %212 = arith.subf %208, %211 : vector<2x8x8xf32>
    %213 = math.exp %212 : vector<2x8x8xf32>
    %cst_84 = arith.constant dense<0.000000e+00> : vector<2x8xf32>
    %214 = vector.multi_reduction <add>, %213, %cst_84 [2] : vector<2x8x8xf32> to vector<2x8xf32>
    %215 = vector.shape_cast %214 : vector<2x8xf32> to vector<2x8x1xf32>
    %216 = tpu.reciprocal %215 {approx = true} : vector<2x8x1xf32> -> vector<2x8x1xf32>
    %217 = vector.broadcast %216 : vector<2x8x1xf32> to vector<2x8x8xf32>
    %218 = arith.mulf %213, %217 : vector<2x8x8xf32>
    %219 = arith.truncf %218 : vector<2x8x8xf32> to vector<2x8x8xbf16>
    %220 = arith.truncf %200 : vector<2x8x16xf32> to vector<2x8x16xbf16>
    "tpu.trace_start"() <{level = 10 : i32, message = "bqk,bkd->bqd"}> : () -> ()
    %cst_85 = arith.constant dense<0.000000e+00> : vector<2x8x16xf32>
    %221 = tpu.matmul %219, %220, %cst_85 {dimension_numbers = #tpu.dot_dimension_numbers<[2], [1], [1], [2], [0, 0, 0, 1, 1, 2], [0], [0]>} : vector<2x8x8xbf16>, vector<2x8x16xbf16>, vector<2x8x16xf32> -> vector<2x8x16xf32>
    "tpu.trace_stop"() : () -> ()
    %222 = vector.shape_cast %221 : vector<2x8x16xf32> to vector<16x16xf32>
    %223 = vector.extract_strided_slice %194 {offsets = [0, 16], sizes = [16, 16], strides = [1, 1]} : vector<16x96xf32> to vector<16x16xf32>
    %224 = vector.shape_cast %223 : vector<16x16xf32> to vector<2x8x16xf32>
    %225 = vector.extract_strided_slice %194 {offsets = [0, 48], sizes = [16, 16], strides = [1, 1]} : vector<16x96xf32> to vector<16x16xf32>
    %226 = vector.shape_cast %225 : vector<16x16xf32> to vector<2x8x16xf32>
    %227 = vector.extract_strided_slice %194 {offsets = [0, 80], sizes = [16, 16], strides = [1, 1]} : vector<16x96xf32> to vector<16x16xf32>
    %228 = vector.shape_cast %227 : vector<16x16xf32> to vector<2x8x16xf32>
    %229 = arith.truncf %224 : vector<2x8x16xf32> to vector<2x8x16xbf16>
    %230 = arith.truncf %226 : vector<2x8x16xf32> to vector<2x8x16xbf16>
    "tpu.trace_start"() <{level = 10 : i32, message = "bqd,bkd->bqk"}> : () -> ()
    %cst_86 = arith.constant dense<0.000000e+00> : vector<2x8x8xf32>
    %231 = tpu.matmul %229, %230, %cst_86 {dimension_numbers = #tpu.dot_dimension_numbers<[2], [2], [1], [1], [0, 0, 0, 1, 1, 1], [0], [0]>} : vector<2x8x16xbf16>, vector<2x8x16xbf16>, vector<2x8x8xf32> -> vector<2x8x8xf32>
    "tpu.trace_stop"() : () -> ()
    %cst_87 = arith.constant 2.500000e-01 : f32
    %232 = vector.broadcast %cst_87 : f32 to vector<2x8x8xf32>
    %233 = arith.mulf %231, %232 : vector<2x8x8xf32>
    %234 = vector.shape_cast %0 : vector<2x8xf32> to vector<2x1x8xf32>
    %235 = vector.broadcast %234 : vector<2x1x8xf32> to vector<2x8x8xf32>
    %236 = arith.addf %233, %235 : vector<2x8x8xf32>
    %cst_88 = arith.constant dense<0xFF800000> : vector<2x8xf32>
    %237 = vector.multi_reduction <maximumf>, %236, %cst_88 [2] : vector<2x8x8xf32> to vector<2x8xf32>
    %238 = vector.shape_cast %237 : vector<2x8xf32> to vector<2x8x1xf32>
    %239 = vector.broadcast %238 : vector<2x8x1xf32> to vector<2x8x8xf32>
    %240 = arith.subf %236, %239 : vector<2x8x8xf32>
    %241 = math.exp %240 : vector<2x8x8xf32>
    %cst_89 = arith.constant dense<0.000000e+00> : vector<2x8xf32>
    %242 = vector.multi_reduction <add>, %241, %cst_89 [2] : vector<2x8x8xf32> to vector<2x8xf32>
    %243 = vector.shape_cast %242 : vector<2x8xf32> to vector<2x8x1xf32>
    %244 = tpu.reciprocal %243 {approx = true} : vector<2x8x1xf32> -> vector<2x8x1xf32>
    %245 = vector.broadcast %244 : vector<2x8x1xf32> to vector<2x8x8xf32>
    %246 = arith.mulf %241, %245 : vector<2x8x8xf32>
    %247 = arith.truncf %246 : vector<2x8x8xf32> to vector<2x8x8xbf16>
    %248 = arith.truncf %228 : vector<2x8x16xf32> to vector<2x8x16xbf16>
    "tpu.trace_start"() <{level = 10 : i32, message = "bqk,bkd->bqd"}> : () -> ()
    %cst_90 = arith.constant dense<0.000000e+00> : vector<2x8x16xf32>
    %249 = tpu.matmul %247, %248, %cst_90 {dimension_numbers = #tpu.dot_dimension_numbers<[2], [1], [1], [2], [0, 0, 0, 1, 1, 2], [0], [0]>} : vector<2x8x8xbf16>, vector<2x8x16xbf16>, vector<2x8x16xf32> -> vector<2x8x16xf32>
    "tpu.trace_stop"() : () -> ()
    %250 = vector.shape_cast %249 : vector<2x8x16xf32> to vector<16x16xf32>
    %251 = tpu.concatenate %222, %250 in 1 : vector<16x16xf32>, vector<16x16xf32> -> vector<16x32xf32>
    %c1_91 = arith.constant 1 : index
    %c0_92 = arith.constant 0 : index
    %c0_93 = arith.constant 0 : index
    %252 = vector.load %arg6[%c1_91, %c0_92, %c0_93] : memref<2x32x32xf32, #tpu.memory_space<vmem>>, vector<1x32x32xf32>
    %253 = vector.shape_cast %252 : vector<1x32x32xf32> to vector<32x32xf32>
    %254 = arith.truncf %251 : vector<16x32xf32> to vector<16x32xbf16>
    %255 = arith.truncf %253 : vector<32x32xf32> to vector<32x32xbf16>
    %cst_94 = arith.constant dense<0.000000e+00> : vector<16x32xf32>
    %256 = tpu.matmul %254, %255, %cst_94 {dimension_numbers = #tpu.dot_dimension_numbers<[1], [0], [0], [1], [0, 0, 1, 1], [], []>} : vector<16x32xbf16>, vector<32x32xbf16>, vector<16x32xf32> -> vector<16x32xf32>
    %c1_95 = arith.constant 1 : index
    %c0_96 = arith.constant 0 : index
    %c0_97 = arith.constant 0 : index
    %257 = vector.load %arg7[%c1_95, %c0_96, %c0_97] : memref<2x1x32xf32, #tpu.memory_space<vmem>>, vector<1x1x32xf32>
    %258 = vector.shape_cast %257 : vector<1x1x32xf32> to vector<1x32xf32>
    %259 = vector.broadcast %258 : vector<1x32xf32> to vector<16x32xf32>
    %260 = arith.addf %256, %259 : vector<16x32xf32>
    %261 = arith.addf %260, %185 : vector<16x32xf32>
    %c1_98 = arith.constant 1 : index
    %c0_99 = arith.constant 0 : index
    %c0_100 = arith.constant 0 : index
    %262 = vector.load %arg8[%c1_98, %c0_99, %c0_100] : memref<2x1x32xf32, #tpu.memory_space<vmem>>, vector<1x1x32xf32>
    %263 = vector.shape_cast %262 : vector<1x1x32xf32> to vector<1x32xf32>
    %c1_101 = arith.constant 1 : index
    %c0_102 = arith.constant 0 : index
    %c0_103 = arith.constant 0 : index
    %264 = vector.load %arg9[%c1_101, %c0_102, %c0_103] : memref<2x1x32xf32, #tpu.memory_space<vmem>>, vector<1x1x32xf32>
    %265 = vector.shape_cast %264 : vector<1x1x32xf32> to vector<1x32xf32>
    %cst_104 = arith.constant dense<0.000000e+00> : vector<16xf32>
    %266 = vector.multi_reduction <add>, %261, %cst_104 [1] : vector<16x32xf32> to vector<16xf32>
    %267 = vector.shape_cast %266 : vector<16xf32> to vector<16x1xf32>
    %cst_105 = arith.constant 3.200000e+01 : f32
    %268 = vector.broadcast %cst_105 : f32 to vector<16x1xf32>
    %269 = arith.divf %267, %268 : vector<16x1xf32>
    %270 = vector.broadcast %269 : vector<16x1xf32> to vector<16x32xf32>
    %271 = arith.subf %261, %270 : vector<16x32xf32>
    %272 = arith.mulf %271, %271 : vector<16x32xf32>
    %cst_106 = arith.constant dense<0.000000e+00> : vector<16xf32>
    %273 = vector.multi_reduction <add>, %272, %cst_106 [1] : vector<16x32xf32> to vector<16xf32>
    %274 = vector.shape_cast %273 : vector<16xf32> to vector<16x1xf32>
    %cst_107 = arith.constant 3.200000e+01 : f32
    %275 = vector.broadcast %cst_107 : f32 to vector<16x1xf32>
    %276 = arith.divf %274, %275 : vector<16x1xf32>
    %277 = vector.broadcast %269 : vector<16x1xf32> to vector<16x32xf32>
    %278 = arith.subf %261, %277 : vector<16x32xf32>
    %cst_108 = arith.constant 9.99999996E-13 : f32
    %279 = vector.broadcast %cst_108 : f32 to vector<16x1xf32>
    %280 = arith.addf %276, %279 : vector<16x1xf32>
    %281 = math.rsqrt %280 : vector<16x1xf32>
    %282 = vector.broadcast %281 : vector<16x1xf32> to vector<16x32xf32>
    %283 = arith.mulf %278, %282 : vector<16x32xf32>
    %284 = vector.broadcast %263 : vector<1x32xf32> to vector<16x32xf32>
    %285 = arith.mulf %283, %284 : vector<16x32xf32>
    %286 = vector.broadcast %265 : vector<1x32xf32> to vector<16x32xf32>
    %287 = arith.addf %285, %286 : vector<16x32xf32>
    %c1_109 = arith.constant 1 : index
    %c0_110 = arith.constant 0 : index
    %c0_111 = arith.constant 0 : index
    %288 = vector.load %arg10[%c1_109, %c0_110, %c0_111] : memref<2x32x64xf32, #tpu.memory_space<vmem>>, vector<1x32x64xf32>
    %289 = vector.shape_cast %288 : vector<1x32x64xf32> to vector<32x64xf32>
    %290 = arith.truncf %287 : vector<16x32xf32> to vector<16x32xbf16>
    %291 = arith.truncf %289 : vector<32x64xf32> to vector<32x64xbf16>
    %cst_112 = arith.constant dense<0.000000e+00> : vector<16x64xf32>
    %292 = tpu.matmul %290, %291, %cst_112 {dimension_numbers = #tpu.dot_dimension_numbers<[1], [0], [0], [1], [0, 0, 1, 1], [], []>} : vector<16x32xbf16>, vector<32x64xbf16>, vector<16x64xf32> -> vector<16x64xf32>
    %c1_113 = arith.constant 1 : index
    %c0_114 = arith.constant 0 : index
    %c0_115 = arith.constant 0 : index
    %293 = vector.load %arg11[%c1_113, %c0_114, %c0_115] : memref<2x1x64xf32, #tpu.memory_space<vmem>>, vector<1x1x64xf32>
    %294 = vector.shape_cast %293 : vector<1x1x64xf32> to vector<1x64xf32>
    %295 = vector.broadcast %294 : vector<1x64xf32> to vector<16x64xf32>
    %296 = arith.addf %292, %295 : vector<16x64xf32>
    %297 = arith.mulf %296, %296 : vector<16x64xf32>
    %298 = arith.mulf %296, %297 : vector<16x64xf32>
    %cst_116 = arith.constant 4.471500e-02 : f32
    %299 = vector.broadcast %cst_116 : f32 to vector<16x64xf32>
    %300 = arith.mulf %299, %298 : vector<16x64xf32>
    %301 = arith.addf %296, %300 : vector<16x64xf32>
    %cst_117 = arith.constant 0.797884583 : f32
    %302 = vector.broadcast %cst_117 : f32 to vector<16x64xf32>
    %303 = arith.mulf %302, %301 : vector<16x64xf32>
    %304 = math.tanh %303 : vector<16x64xf32>
    %cst_118 = arith.constant 1.000000e+00 : f32
    %305 = vector.broadcast %cst_118 : f32 to vector<16x64xf32>
    %306 = arith.addf %305, %304 : vector<16x64xf32>
    %cst_119 = arith.constant 5.000000e-01 : f32
    %307 = vector.broadcast %cst_119 : f32 to vector<16x64xf32>
    %308 = arith.mulf %307, %306 : vector<16x64xf32>
    %309 = arith.mulf %296, %308 : vector<16x64xf32>
    %c1_120 = arith.constant 1 : index
    %c0_121 = arith.constant 0 : index
    %c0_122 = arith.constant 0 : index
    %310 = vector.load %arg12[%c1_120, %c0_121, %c0_122] : memref<2x64x32xf32, #tpu.memory_space<vmem>>, vector<1x64x32xf32>
    %311 = vector.shape_cast %310 : vector<1x64x32xf32> to vector<64x32xf32>
    %312 = arith.truncf %309 : vector<16x64xf32> to vector<16x64xbf16>
    %313 = arith.truncf %311 : vector<64x32xf32> to vector<64x32xbf16>
    %cst_123 = arith.constant dense<0.000000e+00> : vector<16x32xf32>
    %314 = tpu.matmul %312, %313, %cst_123 {dimension_numbers = #tpu.dot_dimension_numbers<[1], [0], [0], [1], [0, 0, 1, 1], [], []>} : vector<16x64xbf16>, vector<64x32xbf16>, vector<16x32xf32> -> vector<16x32xf32>
    %c1_124 = arith.constant 1 : index
    %c0_125 = arith.constant 0 : index
    %c0_126 = arith.constant 0 : index
    %315 = vector.load %arg13[%c1_124, %c0_125, %c0_126] : memref<2x1x32xf32, #tpu.memory_space<vmem>>, vector<1x1x32xf32>
    %316 = vector.shape_cast %315 : vector<1x1x32xf32> to vector<1x32xf32>
    %317 = vector.broadcast %316 : vector<1x32xf32> to vector<16x32xf32>
    %318 = arith.addf %314, %317 : vector<16x32xf32>
    %319 = arith.addf %318, %287 : vector<16x32xf32>
    %c1_127 = arith.constant 1 : index
    %c0_128 = arith.constant 0 : index
    %c0_129 = arith.constant 0 : index
    %320 = vector.load %arg14[%c1_127, %c0_128, %c0_129] : memref<2x1x32xf32, #tpu.memory_space<vmem>>, vector<1x1x32xf32>
    %321 = vector.shape_cast %320 : vector<1x1x32xf32> to vector<1x32xf32>
    %c1_130 = arith.constant 1 : index
    %c0_131 = arith.constant 0 : index
    %c0_132 = arith.constant 0 : index
    %322 = vector.load %arg15[%c1_130, %c0_131, %c0_132] : memref<2x1x32xf32, #tpu.memory_space<vmem>>, vector<1x1x32xf32>
    %323 = vector.shape_cast %322 : vector<1x1x32xf32> to vector<1x32xf32>
    %cst_133 = arith.constant dense<0.000000e+00> : vector<16xf32>
    %324 = vector.multi_reduction <add>, %319, %cst_133 [1] : vector<16x32xf32> to vector<16xf32>
    %325 = vector.shape_cast %324 : vector<16xf32> to vector<16x1xf32>
    %cst_134 = arith.constant 3.200000e+01 : f32
    %326 = vector.broadcast %cst_134 : f32 to vector<16x1xf32>
    %327 = arith.divf %325, %326 : vector<16x1xf32>
    %328 = vector.broadcast %327 : vector<16x1xf32> to vector<16x32xf32>
    %329 = arith.subf %319, %328 : vector<16x32xf32>
    %330 = arith.mulf %329, %329 : vector<16x32xf32>
    %cst_135 = arith.constant dense<0.000000e+00> : vector<16xf32>
    %331 = vector.multi_reduction <add>, %330, %cst_135 [1] : vector<16x32xf32> to vector<16xf32>
    %332 = vector.shape_cast %331 : vector<16xf32> to vector<16x1xf32>
    %cst_136 = arith.constant 3.200000e+01 : f32
    %333 = vector.broadcast %cst_136 : f32 to vector<16x1xf32>
    %334 = arith.divf %332, %333 : vector<16x1xf32>
    %335 = vector.broadcast %327 : vector<16x1xf32> to vector<16x32xf32>
    %336 = arith.subf %319, %335 : vector<16x32xf32>
    %cst_137 = arith.constant 9.99999996E-13 : f32
    %337 = vector.broadcast %cst_137 : f32 to vector<16x1xf32>
    %338 = arith.addf %334, %337 : vector<16x1xf32>
    %339 = math.rsqrt %338 : vector<16x1xf32>
    %340 = vector.broadcast %339 : vector<16x1xf32> to vector<16x32xf32>
    %341 = arith.mulf %336, %340 : vector<16x32xf32>
    %342 = vector.broadcast %321 : vector<1x32xf32> to vector<16x32xf32>
    %343 = arith.mulf %341, %342 : vector<16x32xf32>
    %344 = vector.broadcast %323 : vector<1x32xf32> to vector<16x32xf32>
    %345 = arith.addf %343, %344 : vector<16x32xf32>
    %346 = vector.extract_strided_slice %345 {offsets = [0, 0], sizes = [1, 32], strides = [1, 1]} : vector<16x32xf32> to vector<1x32xf32>
    %347 = vector.extract_strided_slice %345 {offsets = [8, 0], sizes = [1, 32], strides = [1, 1]} : vector<16x32xf32> to vector<1x32xf32>
    %348 = tpu.concatenate %346, %347 in 0 : vector<1x32xf32>, vector<1x32xf32> -> vector<2x32xf32>
    %c0_138 = arith.constant 0 : index
    %c0_139 = arith.constant 0 : index
    %349 = vector.load %arg16[%c0_138, %c0_139] : memref<32x32xf32, #tpu.memory_space<vmem>>, vector<32x32xf32>
    %350 = arith.truncf %348 : vector<2x32xf32> to vector<2x32xbf16>
    %351 = arith.truncf %349 : vector<32x32xf32> to vector<32x32xbf16>
    %cst_140 = arith.constant dense<0.000000e+00> : vector<2x32xf32>
    %352 = tpu.matmul %350, %351, %cst_140 {dimension_numbers = #tpu.dot_dimension_numbers<[1], [0], [0], [1], [0, 0, 1, 1], [], []>} : vector<2x32xbf16>, vector<32x32xbf16>, vector<2x32xf32> -> vector<2x32xf32>
    %c0_141 = arith.constant 0 : index
    %c0_142 = arith.constant 0 : index
    %353 = vector.load %arg17[%c0_141, %c0_142] : memref<1x32xf32, #tpu.memory_space<vmem>>, vector<1x32xf32>
    %354 = vector.broadcast %353 : vector<1x32xf32> to vector<2x32xf32>
    %355 = arith.addf %352, %354 : vector<2x32xf32>
    %356 = math.tanh %355 : vector<2x32xf32>
    %c0_143 = arith.constant 0 : index
    %c0_144 = arith.constant 0 : index
    %357 = vector.load %arg18[%c0_143, %c0_144] : memref<32x128xf32, #tpu.memory_space<vmem>>, vector<32x128xf32>
    %358 = arith.truncf %356 : vector<2x32xf32> to vector<2x32xbf16>
    %359 = arith.truncf %357 : vector<32x128xf32> to vector<32x128xbf16>
    %cst_145 = arith.constant dense<0.000000e+00> : vector<2x128xf32>
    %360 = tpu.matmul %358, %359, %cst_145 {dimension_numbers = #tpu.dot_dimension_numbers<[1], [0], [0], [1], [0, 0, 1, 1], [], []>} : vector<2x32xbf16>, vector<32x128xbf16>, vector<2x128xf32> -> vector<2x128xf32>
    %c0_146 = arith.constant 0 : index
    %c0_147 = arith.constant 0 : index
    %361 = vector.load %arg19[%c0_146, %c0_147] : memref<1x128xf32, #tpu.memory_space<vmem>>, vector<1x128xf32>
    %362 = vector.broadcast %361 : vector<1x128xf32> to vector<2x128xf32>
    %363 = arith.addf %360, %362 : vector<2x128xf32>
    %c0_148 = arith.constant 0 : index
    %c0_149 = arith.constant 0 : index
    %364 = vector.load %arg20[%c0_148, %c0_149] : memref<2x128xf32, #tpu.memory_space<vmem>>, vector<2x128xf32>
    tpu.vector_store %arg20[%c0_148, %c0_149], %363 {strides = array<i32>} : memref<2x128xf32, #tpu.memory_space<vmem>>, vector<2x128xf32>,
    return
  }
}

</mosaic_0001>

<bundles_post_ra>
// kernel: bert_classifier_forward.1
= control target key start
LH: loop header
LB: loop body
LE: loop exit
PB: predicated region body
PF: predicated region fallthrough
CT: control target
= control target key end

     0   :  { %s2959_s0 = inlined_call_operand.vmem [shape: f32[16,32], index: 0, kind: input, shape index: {}]   ;;  %s2960_s1 = inlined_call_operand.vmem [shape: f32[2,8], index: 1, kind: input, shape index: {}]   ;;  %s2961_s2 = inlined_call_operand.vmem [shape: f32[1,32], index: 2, kind: input, shape index: {}]   ;;  %s2962_s3 = inlined_call_operand.vmem [shape: f32[1,32], index: 3, kind: input, shape index: {}]   ;;  %s2963_s4 = inlined_call_operand.vmem [shape: f32[2,32,96], index: 4, kind: input, shape index: {}]   ;;  %s2964_s5 = inlined_call_operand.vmem [shape: f32[2,1,96], index: 5, kind: input, shape index: {}]   ;;  %s2965_s6 = inlined_call_operand.vmem [shape: f32[2,32,32], index: 6, kind: input, shape index: {}]   ;;  %s2966_s7 = inlined_call_operand.vmem [shape: f32[2,1,32], index: 7, kind: input, shape index: {}]   ;;  %s2967_s8 = inlined_call_operand.vmem [shape: f32[2,1,32], index: 8, kind: input, shape index: {}]   ;;  %s2968_s9 = inlined_call_operand.vmem [shape: f32[2,1,32], index: 9, kind: input, shape index: {}]   ;;  %s2969_s10 = inlined_call_operand.vmem [shape: f32[2,32,64], index: 10, kind: input, shape index: {}]   ;;  %s2970_s11 = inlined_call_operand.vmem [shape: f32[2,1,64], index: 11, kind: input, shape index: {}]   ;;  %s2971_s12 = inlined_call_operand.vmem [shape: f32[2,64,32], index: 12, kind: input, shape index: {}]   ;;  %s2972_s13 = inlined_call_operand.vmem [shape: f32[2,1,32], index: 13, kind: input, shape index: {}]   ;;  %s2973_s14 = inlined_call_operand.vmem [shape: f32[2,1,32], index: 14, kind: input, shape index: {}]   ;;  %s2974_s15 = inlined_call_operand.vmem [shape: f32[2,1,32], index: 15, kind: input, shape index: {}]   ;;  %s2975_s16 = inlined_call_operand.vmem [shape: f32[32,32], index: 16, kind: input, shape index: {}]   ;;  %s2976_s17 = inlined_call_operand.vmem [shape: f32[1,32], index: 17, kind: input, shape index: {}]   ;;  %s2977_s18 = inlined_call_operand.vmem [shape: f32[32,128], index: 18, kind: input, shape index: {}]   ;;  %s2978_s19 = inlined_call_operand.vmem [shape: f32[1,128], index: 19, kind: input, shape index: {}]   ;;  %s2979_s20 = inlined_call_operand.hbm [shape: f32[2,128], index: 20, kind: output, shape index: {}]  }
   0x1   :  { %2982 = sst [smem:[#allocation5_spill]] %s2959_s0 }
   0x2   :  { %2983 = sst [smem:[#allocation6_spill]] %s2960_s1 }
   0x3   :  { %2984 = sst [smem:[#allocation7_spill]] %s2961_s2 }
   0x4   :  { %2985 = sst [smem:[#allocation8_spill]] %s2962_s3 }
   0x5   :  { %2986 = sst [smem:[#allocation9_spill]] %s2963_s4 }
   0x6   :  { %s2987_s23 = sld [smem:[#allocation5_spill]]  ;;  %vm72_vm0 = vcmask 261120  }
   0xc   :  { %v68_v0 = vld [vmem:[%s2987_s23] sm:$0xff]  ;;  %v69_v1 = vld [vmem:[%s2987_s23 + $0x8] sm:$0xff] }
   0xd   :  { %25 = vsyncpa [#allocation3], 0  ;;  %v73_v2 = vsel %vm72_vm0, %v68_v0, 0.0  ;;  %v76_v3 = vsel %vm72_vm0, %v69_v1, 0.0  ;;  %s2988_s26 = sld [smem:[#allocation9_spill]]  ;;  %v2343_v17 = vmov 0.0   ;;  %v289_v53 = vlaneseq }
   0xe   :  { %74 = vadd.xlane.f32.xlu0 %v73_v2  ;;  %2053 = vmatprep.subr.bf16.mxu0 %v2343_v17  ;;  %vm2344_vm1 = vmmov 0   ;;  %s2989_s22 = sld [smem:[#allocation7_spill]]  ;;  %s2990_s2 = sld [smem:[#allocation8_spill]]  ;;  %v1914_v38 = vld [vmem:[%s2964_s5] ss:$0 sm:$0xff]  ;;  %vm179_vm2 = vcmask 130048  }
   0xf   :  { %2061 = vmatprep.subr.bf16.mxu1 %v2343_v17  ;;  %2057 = vmatprep.mubr.msk.bf16.mxu0 %vm2344_vm1, %v2343_v17  ;;  %s2345_s27 = smov 96   ;;  %v2346_v51 = vmov 1966171168   ;;  %v290_v55 = vshrl.u32 %v289_v53, 7  ;;  %s2991_s29 = sld [smem:[#allocation6_spill]]  ;;  %vm312_vm3 = vcmask 64512  }
  0x10   :  { %2063 = vmatprep.mubr.msk.bf16.mxu1 %vm2344_vm1, %v2343_v17  ;;  %v287_v52 = vunpack.c.l.s4 %v2346_v51  ;;  %s2347_s30 = smov 64   ;;  %s2348_s0 = smov 80   ;;  %vm342_vm4 = vcmask 1043456   ;;  %vm868_vm5 = vcmask 523264   ;;  %vm1780_vm6 = vcmask 1040384  }
  0x11   :  { %v302_v60 = vsub.s32 0, %v290_v55  ;;  %s2349_s21 = smov 112   ;;  %s2350_s1 = smov 48  }
  0x12   :  { %77 = vadd.xlane.f32.xlu0 %v76_v3  ;;  %v288_v54 = vunpack.c.0.s8 %v287_v52 }
  0x13   :  { %v116_v14 = vld [vmem:[%s2988_s26] sm:$0xff]  ;;  %v117_v15 = vld [vmem:[%s2988_s26 + $0x8] sm:$0xff]  ;;  %v118_v18 = vld [vmem:[%s2988_s26 + $0x10] sm:$0xff] }
  0x14   :  { %v121_v16 = vpack.c.bf16 %v117_v15, %v116_v14  ;;  %v119_v19 = vld [vmem:[%s2988_s26 + $0x18] sm:$0xff]  ;;  %v1912_v29 = vld [vmem:[%s2989_s22] ss:$0 sm:$0xff]  ;;  %v291_v57 = vsub.s32 %v288_v54, %v290_v55 }
  0x15   :  { %v122_v20 = vpack.c.bf16 %v119_v19, %v118_v18  ;;  %v1913_v33 = vld [vmem:[%s2990_s2] ss:$0 sm:$0xff] }
  0x16   :  { %2054 = vmatpush3.bf16.msra.mxu0 %v121_v16  ;;  %v1918_v56 = vld.sshfl [vmem:[%s2991_s29] sm:$0x11 pattern:$0x75316420]  ;;  %s2351_s29 = smov 16  }
  0x17   :  { %2055 = vmatprep.subr.bf16.mxu0 %v2343_v17  ;;  %v285_v58 = vcombine.high %v1918_v56, %v1918_v56  ;;  %v292_v59 = vrot.slane %v1918_v56, %v291_v57 }
  0x19   :  { %v299_v61 = vrot.slane %v285_v58, %v291_v57  ;;  %v2529_v62 = vrot.slane %v292_v59, %v302_v60 }
  0x1a   :  { %2056 = vmatpush3.bf16.msra.mxu0 %v122_v20 }
  0x1b   :  { %2067 = vmatprep.subr.bf16.mxu0 %v2343_v17  ;;  %v2531_v2 = vrot.slane %v299_v61, %v302_v60 }
  0x9b   :  { %v75_v4 = vpop.xlane.xlu0 %74 }
  0x9c   :  { %v80_v5 = vmul.f32 0.03125, %v75_v4 }
  0x9e   :  { %v82_v6 = vsub.f32 %v68_v0, %v80_v5 }
  0x9f   :  { %v78_v7 = vpop.xlane.xlu0 %77 }
  0xa0   :  { %v81_v8 = vmul.f32 0.03125, %v78_v7  ;;  %v84_v9 = vmul.f32 %v82_v6, %v82_v6 }
  0xa2   :  { %v83_v10 = vsub.f32 %v69_v1, %v81_v8  ;;  %v86_v11 = vsel %vm72_vm0, %v84_v9, 0.0 }
  0xa3   :  { %87 = vadd.xlane.f32.xlu1 %v86_v11 }
  0xa4   :  { %v85_v12 = vmul.f32 %v83_v10, %v83_v10 }
  0xa6   :  { %v89_v13 = vsel %vm72_vm0, %v85_v12, 0.0 }
  0xa7   :  { %90 = vadd.xlane.f32.xlu1 %v89_v13 }
 0x130   :  { %v88_v21 = vpop.xlane.xlu1 %87 }
 0x131   :  { %v92_v22 = vmul.f32 0.03125, %v88_v21 }
 0x133   :  { %v94_v23 = vadd.f32 1e-12, %v92_v22 }
 0x134   :  { %v91_v24 = vpop.xlane.xlu1 %90 }
 0x135   :  { %2257 = vrsqrt.f32 %v94_v23  ;;  %v93_v25 = vmul.f32 0.03125, %v91_v24 }
 0x137   :  { %v95_v26 = vadd.f32 1e-12, %v93_v25 }
 0x139   :  { %2259 = vrsqrt.f32 %v95_v26 }
 0x13f   :  { %v2258_v27 = vpop.eup %2257 }
 0x140   :  { %v98_v28 = vmul.f32 %v2258_v27, %v82_v6 }
 0x142   :  { %v106_v32 = vmul.f32 %v1912_v29, %v98_v28 }
 0x143   :  { %v2260_v30 = vpop.eup %2259 }
 0x144   :  { %v99_v31 = vmul.f32 %v2260_v30, %v83_v10  ;;  %v2494_v35 = vadd.f32 %v1913_v33, %v106_v32 }
 0x146   :  { %v107_v34 = vmul.f32 %v1912_v29, %v99_v31 }
 0x148   :  { %v2496_v36 = vadd.f32 %v1913_v33, %v107_v34 }
 0x14a   :  { %v120_v37 = vpack.c.bf16 %v2496_v36, %v2494_v35 }
 0x14c   :  { %2058 = vmatmul.mubr.msk.bf16.vlgmr.msra.gmra.mrb[0].mxu0 %vm72_vm0, %v120_v37 }
 0x14d   :  { %2069 = vmatprep.mubr.msk.bf16.mxu0 %vm2344_vm1, %v2343_v17 }
 0x21f   :  { %v167_v39 = vpop.f32.mrb[0].mxu0 }
 0x220   :  { %v168_v40 = vadd.f32 %v1914_v38, %v167_v39  ;;  %v2059_v41 = vpop.f32.mrb[1].mxu0 }
 0x221   :  { %v170_v42 = vpop.f32.mrb[2].mxu0 }
 0x222   :  { %v2506_v43 = vpack.c.bf16 %v168_v40, %v168_v40  ;;  %v171_v44 = vadd.f32 %v1914_v38, %v170_v42  ;;  %v2060_v45 = vpop.f32.mrb[3].mxu0 }
 0x224   :  { %v2508_v46 = vpack.c.bf16 %v171_v44, %v171_v44  ;;  %177 = vrot.lane.b32.xlu0 %v2506_v43, %s2345_s27 }
 0x226   :  { %227 = vrot.lane.b32.xlu1 %v2508_v46, %s2345_s27 }
 0x296   :  { %v178_v47 = vpop.permute.xlu0 %177 }
 0x297   :  { %v184_v48 = vsel %vm179_vm2, %v178_v47, 0 }
 0x298   :  { %2062 = vmatpush3.bf16.xpose.msra.mxu1 %v184_v48  ;;  %v228_v49 = vpop.permute.xlu1 %227 }
 0x299   :  { %v233_v50 = vsel %vm179_vm2, %v228_v49, 0  ;;  %2073 = vmatprep.subr.bf16.mxu1 %v2343_v17 }
 0x29a   :  { %2068 = vmatpush3.bf16.xpose.msra.mxu0 %v233_v50 }
 0x29b   :  { %2079 = vmatprep.subr.bf16.mxu0 %v2343_v17 }
 0x29f   :  { %2064 = vmatmul.mubr.msk.bf16.vlgmr.msra.gmra.mrb[0].mxu1 %vm179_vm2, %v2506_v43 }
 0x2a0   :  { %2075 = vmatprep.mubr.msk.bf16.mxu1 %vm2344_vm1, %v2343_v17 }
 0x2a1   :  { %2070 = vmatmul.mubr.msk.bf16.vlgmr.msra.gmra.mrb[4].mxu0 %vm179_vm2, %v2508_v46 }
 0x2a2   :  { %2081 = vmatprep.mubr.msk.bf16.mxu0 %vm2344_vm1, %v2343_v17 }
 0x372   :  { %v220_v63 = vpop.f32.mrb[0].mxu1 }
 0x373   :  { %v275_v0 = vmul.f32 0.25, %v220_v63  ;;  %v2065_v1 = vpop.f32.mrb[1].mxu1 }
 0x374   :  { %v223_v3 = vpop.f32.mrb[2].mxu1  ;;  %v269_v4 = vpop.f32.mrb[4].mxu0 }
 0x375   :  { %v276_v5 = vmul.f32 0.25, %v269_v4  ;;  %v2066_v6 = vpop.f32.mrb[3].mxu1  ;;  %v2071_v7 = vpop.f32.mrb[5].mxu0  ;;  %v310_v8 = vadd.f32 %v2529_v62, %v275_v0 }
 0x376   :  { %v272_v9 = vpop.f32.mrb[6].mxu0 }
 0x377   :  { %v2072_v10 = vpop.f32.mrb[7].mxu0  ;;  %v313_v11 = vsel %vm312_vm3, %v310_v8, -inf  ;;  %v311_v12 = vadd.f32 %v2531_v2, %v276_v5 }
 0x378   :  { %314 = vmax.xlane.f32.xlu1 %v313_v11 }
 0x379   :  { %v316_v13 = vsel %vm312_vm3, %v311_v12, -inf }
 0x37a   :  { %317 = vmax.xlane.f32.xlu0 %v316_v13 }
 0x389   :  { %386 = vrot.lane.b32.xlu1 %v2508_v46, %s2347_s30 }
 0x38d   :  { %436 = vrot.lane.b32.xlu1 %v2506_v43, %s2348_s0 }
 0x405   :  { %v315_v14 = vpop.xlane.xlu1 %314 }
 0x406   :  { %v319_v15 = vsub.f32 %v310_v8, %v315_v14 }
 0x407   :  { %v318_v16 = vpop.xlane.xlu0 %317 }
 0x408   :  { %v321_v18 = vmul.f32 1.442695, %v319_v15  ;;  %v320_v19 = vsub.f32 %v311_v12, %v318_v16 }
 0x409   :  { %v387_v20 = vpop.permute.xlu1 %386 }
 0x40a   :  { %2261 = vpow2.f32 %v321_v18  ;;  %v323_v21 = vmul.f32 1.442695, %v320_v19  ;;  %v392_v22 = vsel %vm342_vm4, %v387_v20, 0 }
 0x40b   :  { %2080 = vmatpush3.bf16.msra.mxu0 %v392_v22 }
 0x40c   :  { %2263 = vpow2.f32 %v323_v21  ;;  %2091 = vmatprep.subr.bf16.mxu0 %v2343_v17 }
 0x40d   :  { %v437_v27 = vpop.permute.xlu1 %436 }
 0x40e   :  { %v442_v40 = vsel %vm179_vm2, %v437_v27, 0 }
 0x414   :  { %v2262_v23 = vpop.eup %2261 }
 0x415   :  { %v325_v24 = vsel %vm312_vm3, %v2262_v23, 0.0 }
 0x416   :  { %v2264_v25 = vpop.eup %2263  ;;  %326 = vadd.xlane.f32.xlu0 %v325_v24 }
 0x417   :  { %v328_v26 = vsel %vm312_vm3, %v2264_v25, 0.0 }
 0x418   :  { %329 = vadd.xlane.f32.xlu1 %v328_v26 }
 0x429   :  { %486 = vrot.lane.b32.xlu1 %v2508_v46, %s2348_s0 }
 0x42c   :  { %337 = vrot.lane.b32.xlu0 %v2506_v43, %s2347_s30 }
 0x42d   :  { %484 = vrot.lane.b32.xlu1 %v2508_v46, %s2349_s21 }
 0x430   :  { %434 = vrot.lane.b32.xlu0 %v2506_v43, %s2349_s21 }
 0x4a3   :  { %v327_v28 = vpop.xlane.xlu0 %326 }
 0x4a4   :  { %2265 = vrcp.f32 %v327_v28  ;;  %v668_v28 = vld [vmem:[%s2965_s6] sm:$0xff] }
 0x4a5   :  { %v330_v29 = vpop.xlane.xlu1 %329 }
 0x4a6   :  { %2267 = vrcp.f32 %v330_v29  ;;  %v669_v29 = vld [vmem:[%s2965_s6 + $0x8] sm:$0xff] }
 0x4a7   :  { %v338_v30 = vpop.permute.xlu0 %337 }
 0x4a8   :  { %v344_v31 = vsel %vm342_vm4, %v338_v30, 0  ;;  %v673_v30 = vpack.c.bf16 %v669_v29, %v668_v28 }
 0x4a9   :  { %2074 = vmatpush3.bf16.msra.mxu1 %v344_v31  ;;  %v487_v39 = vpop.permute.xlu1 %486  ;;  %v670_v31 = vld [vmem:[%s2965_s6 + $0x10] sm:$0xff] }
 0x4aa   :  { %2085 = vmatprep.subr.bf16.mxu1 %v2343_v17  ;;  %v492_v42 = vsel %vm179_vm2, %v487_v39, 0 }
 0x4ab   :  { %v435_v44 = vpop.permute.xlu0 %434 }
 0x4ad   :  { %v485_v45 = vpop.permute.xlu1 %484 }
 0x4ae   :  { %v2266_v32 = vpop.eup %2265 }
 0x4af   :  { %v333_v33 = vmul.f32 %v2266_v32, %v2262_v23  ;;  %v671_v32 = vld [vmem:[%s2965_s6 + $0x18] sm:$0xff] }
 0x4b0   :  { %v2268_v34 = vpop.eup %2267 }
 0x4b1   :  { %v334_v37 = vmul.f32 %v2268_v34, %v2264_v25  ;;  %v335_v38 = vpack.c.bf16 %v333_v33, %v333_v33  ;;  %v674_v33 = vpack.c.bf16 %v671_v32, %v670_v31  ;;  %v848_v32 = vld [vmem:[%s2971_s12] sm:$0xff] }
 0x4b3   :  { %2076 = vmatmul.mubr.msk.bf16.vlgmr.msra.gmra.mrb[4].mxu1 %vm312_vm3, %v335_v38  ;;  %v336_v41 = vpack.c.bf16 %v334_v37, %v334_v37 }
 0x4b4   :  { %2086 = vmatpush3.bf16.xpose.msra.mxu1 %v442_v40  ;;  %2087 = vmatprep.mubr.msk.bf16.mxu1 %vm2344_vm1, %v2343_v17 }
 0x4b5   :  { %2082 = vmatmul.mubr.msk.bf16.vlgmr.msra.gmra.mrb[8].mxu0 %vm312_vm3, %v336_v41  ;;  %2097 = vmatprep.subr.bf16.mxu1 %v2343_v17 }
 0x4b6   :  { %2092 = vmatpush3.bf16.xpose.msra.mxu0 %v492_v42  ;;  %2093 = vmatprep.mubr.msk.bf16.mxu0 %vm2344_vm1, %v2343_v17 }
 0x4b7   :  { %2103 = vmatprep.subr.bf16.mxu0 %v2343_v17 }
 0x4bb   :  { %2088 = vmatmul.mubr.msk.bf16.vlgmr.msra.gmra.mrb[8].mxu1 %vm179_vm2, %v435_v44 }
 0x4bc   :  { %2099 = vmatprep.mubr.msk.bf16.mxu1 %vm2344_vm1, %v2343_v17 }
 0x4bd   :  { %2094 = vmatmul.mubr.msk.bf16.vlgmr.msra.gmra.mrb[12].mxu0 %vm179_vm2, %v485_v45 }
 0x4be   :  { %2105 = vmatprep.mubr.msk.bf16.mxu0 %vm2344_vm1, %v2343_v17 }
 0x586   :  { %v2571_v47 = vpop.f32.mrb[4].mxu1 }
 0x587   :  { %v2077_v48 = vpop.f32.mrb[5].mxu1 }
 0x588   :  { %v383_v49 = vpop.f32.mrb[6].mxu1  ;;  %v2573_v50 = vpop.f32.mrb[8].mxu0 }
 0x589   :  { %v2078_v51 = vpop.f32.mrb[7].mxu1  ;;  %v2083_v52 = vpop.f32.mrb[9].mxu0 }
 0x58a   :  { %v431_v53 = vpop.f32.mrb[10].mxu0 }
 0x58b   :  { %v2084_v54 = vpop.f32.mrb[11].mxu0 }
 0x58e   :  { %v478_v55 = vpop.f32.mrb[8].mxu1 }
 0x58f   :  { %v534_v56 = vmul.f32 0.25, %v478_v55  ;;  %v2089_v57 = vpop.f32.mrb[9].mxu1  ;;  %v1925_v55 = vld [vmem:[%s2966_s7] ss:$0 sm:$0xff] }
 0x590   :  { %v481_v58 = vpop.f32.mrb[10].mxu1  ;;  %v528_v59 = vpop.f32.mrb[12].mxu0 }
 0x591   :  { %v535_v60 = vmul.f32 0.25, %v528_v59  ;;  %v2090_v61 = vpop.f32.mrb[11].mxu1  ;;  %v2095_v63 = vpop.f32.mrb[13].mxu0  ;;  %v536_v0 = vadd.f32 %v534_v56, %v2529_v62 }
 0x592   :  { %v531_v1 = vpop.f32.mrb[14].mxu0 }
 0x593   :  { %v2096_v3 = vpop.f32.mrb[15].mxu0  ;;  %v538_v4 = vsel %vm312_vm3, %v536_v0, -inf  ;;  %v537_v5 = vadd.f32 %v535_v60, %v2531_v2 }
 0x594   :  { %539 = vmax.xlane.f32.xlu0 %v538_v4 }
 0x595   :  { %v541_v6 = vsel %vm312_vm3, %v537_v5, -inf }
 0x596   :  { %542 = vmax.xlane.f32.xlu1 %v541_v6 }
 0x5a7   :  { %610 = vrot.lane.b32.xlu1 %v2508_v46, %s2350_s1 }
 0x621   :  { %v540_v7 = vpop.xlane.xlu0 %539 }
 0x622   :  { %v544_v8 = vsub.f32 %v536_v0, %v540_v7 }
 0x623   :  { %v543_v9 = vpop.xlane.xlu1 %542 }
 0x624   :  { %v546_v10 = vmul.f32 1.442695, %v544_v8  ;;  %v545_v11 = vsub.f32 %v537_v5, %v543_v9 }
 0x626   :  { %2269 = vpow2.f32 %v546_v10  ;;  %v548_v12 = vmul.f32 1.442695, %v545_v11  ;;  %v773_v11 = vld [vmem:[%s2969_s10 + $0x8] sm:$0xff] }
 0x627   :  { %v611_v13 = vpop.permute.xlu1 %610 }
 0x628   :  { %2271 = vpow2.f32 %v548_v12  ;;  %v616_v14 = vsel %vm342_vm4, %v611_v13, 0  ;;  %v774_v13 = vld [vmem:[%s2969_s10 + $0x10] sm:$0xff] }
 0x629   :  { %2104 = vmatpush3.bf16.msra.mxu0 %v616_v14  ;;  %v775_v14 = vld [vmem:[%s2969_s10 + $0x18] sm:$0xff] }
 0x62a   :  { %2117 = vmatprep.subr.bf16.mxu0 %v2343_v17 }
 0x630   :  { %v2270_v15 = vpop.eup %2269 }
 0x631   :  { %v550_v16 = vsel %vm312_vm3, %v2270_v15, 0.0 }
 0x632   :  { %v2272_v18 = vpop.eup %2271  ;;  %551 = vadd.xlane.f32.xlu0 %v550_v16 }
 0x633   :  { %v553_v46 = vsel %vm312_vm3, %v2272_v18, 0.0 }
 0x636   :  { %554 = vadd.xlane.f32.xlu0 %v553_v46 }
 0x64c   :  { %562 = vrot.lane.b32.xlu0 %v2506_v43, %s2350_s1 }
 0x6bf   :  { %v552_v19 = vpop.xlane.xlu0 %551 }
 0x6c0   :  { %2273 = vrcp.f32 %v552_v19 }
 0x6c3   :  { %v555_v20 = vpop.xlane.xlu0 %554 }
 0x6c4   :  { %2275 = vrcp.f32 %v555_v20 }
 0x6c7   :  { %v563_v21 = vpop.permute.xlu0 %562 }
 0x6c8   :  { %v568_v22 = vsel %vm342_vm4, %v563_v21, 0 }
 0x6c9   :  { %2098 = vmatpush3.bf16.msra.mxu1 %v568_v22 }
 0x6ca   :  { %v2274_v23 = vpop.eup %2273  ;;  %2109 = vmatprep.subr.bf16.mxu1 %v2343_v17 }
 0x6cb   :  { %v558_v24 = vmul.f32 %v2274_v23, %v2270_v15  ;;  %v778_v15 = vpack.c.bf16 %v775_v14, %v774_v13 }
 0x6cd   :  { %v560_v25 = vpack.c.bf16 %v558_v24, %v558_v24  ;;  %v1927_v24 = vld [vmem:[%s2967_s8] ss:$0 sm:$0xff] }
 0x6ce   :  { %v2276_v26 = vpop.eup %2275 }
 0x6cf   :  { %v559_v27 = vmul.f32 %v2276_v26, %v2272_v18  ;;  %2100 = vmatmul.mubr.msk.bf16.vlgmr.msra.gmra.mrb[12].mxu1 %vm312_vm3, %v560_v25 }
 0x6d0   :  { %2113 = vmatprep.mubr.msk.bf16.mxu1 %vm2344_vm1, %v2343_v17  ;;  %2110 = vmatpush3.bf16.msra.mxu1 %v673_v30 }
 0x6d1   :  { %v561_v43 = vpack.c.bf16 %v559_v27, %v559_v27  ;;  %2111 = vmatprep.subr.bf16.mxu1 %v2343_v17 }
 0x6d3   :  { %2106 = vmatmul.mubr.msk.bf16.vlgmr.msra.gmra.mrb[16].mxu0 %vm312_vm3, %v561_v43  ;;  %v1928_v43 = vld [vmem:[%s2968_s9] ss:$0 sm:$0xff] }
 0x6d4   :  { %2121 = vmatprep.mubr.msk.bf16.mxu0 %vm2344_vm1, %v2343_v17  ;;  %2112 = vmatpush3.bf16.msra.mxu1 %v674_v33  ;;  %v849_v33 = vld [vmem:[%s2971_s12 + $0x8] sm:$0xff] }
 0x6d5   :  { %2125 = vmatprep.subr.bf16.mxu1 %v2343_v17 }
 0x7a2   :  { %v604_v34 = vpop.f32.mrb[12].mxu1 }
 0x7a3   :  { %v2101_v37 = vpop.f32.mrb[13].mxu1 }
 0x7a4   :  { %v607_v38 = vpop.f32.mrb[14].mxu1  ;;  %v850_v37 = vld [vmem:[%s2971_s12 + $0x10] sm:$0xff] }
 0x7a5   :  { %v2102_v39 = vpop.f32.mrb[15].mxu1  ;;  %v851_v38 = vld [vmem:[%s2971_s12 + $0x18] sm:$0xff] }
 0x7a6   :  { %v652_v40 = vpop.f32.mrb[16].mxu0  ;;  %v858_v39 = vpack.c.bf16 %v851_v38, %v850_v37 }
 0x7a7   :  { %v2247_v41 = vpack.i.bf16 %v652_v40, %v604_v34  ;;  %v2107_v42 = vpop.f32.mrb[17].mxu0  ;;  %v857_v34 = vpack.c.bf16 %v849_v33, %v848_v32  ;;  %v852_v40 = vld [vmem:[%s2971_s12 + $0x20] sm:$0xff]  ;;  %v1937_v33 = vld [vmem:[%s2988_s26 + $0x30] sm:$0xff] }
 0x7a8   :  { %v655_v44 = vpop.f32.mrb[18].mxu0 }
 0x7a9   :  { %v2108_v45 = vpop.f32.mrb[19].mxu0  ;;  %2248 = vrot.lane.b32.xlu1 %v2247_v41, %s2351_s29  ;;  %v853_v41 = vld [vmem:[%s2971_s12 + $0x28] sm:$0xff]  ;;  %v854_v44 = vld [vmem:[%s2971_s12 + $0x30] sm:$0xff] }
 0x7aa   :  { %v859_v42 = vpack.c.bf16 %v853_v41, %v852_v40  ;;  %v855_v45 = vld [vmem:[%s2971_s12 + $0x38] sm:$0xff] }
 0x81b   :  { %v2249_v48 = vpop.permute.xlu1 %2248 }
 0x81c   :  { %v2251_v49 = vunpack.i.h.bf16 %v2249_v48  ;;  %v2250_v51 = vunpack.i.l.bf16 %v2249_v48  ;;  %v860_v48 = vpack.c.bf16 %v855_v45, %v854_v44 }
 0x81e   :  { %v667_v52 = vsel %vm179_vm2, %v2573_v50, %v2251_v49  ;;  %v666_v53 = vsel %vm179_vm2, %v2571_v47, %v2250_v51  ;;  %v1929_v49 = vld [vmem:[%s2970_s11] ss:$0 sm:$0xff] }
 0x81f   :  { %v672_v54 = vpack.c.bf16 %v667_v52, %v666_v53 }
 0x821   :  { %2114 = vmatmul.mubr.msk.bf16.vlgmr.msra.gmra.mrb[16].mxu1 %vm72_vm0, %v672_v54 }
 0x822   :  { %2133 = vmatprep.mubr.msk.bf16.mxu1 %vm2344_vm1, %v2343_v17  ;;  %2126 = vmatpush3.bf16.msra.mxu1 %v857_v34  ;;  %v1938_v34 = vld [vmem:[%s2988_s26 + $0x38] sm:$0xff] }
 0x823   :  { %2127 = vmatprep.subr.bf16.mxu1 %v2343_v17  ;;  %v966_v37 = vpack.c.bf16 %v1938_v34, %v1937_v33 }
 0x826   :  { %2128 = vmatpush3.bf16.msra.mxu1 %v858_v39 }
 0x827   :  { %2129 = vmatprep.subr.bf16.mxu1 %v2343_v17 }
 0x82a   :  { %2130 = vmatpush3.bf16.msra.mxu1 %v859_v42 }
 0x82b   :  { %2131 = vmatprep.subr.bf16.mxu1 %v2343_v17 }
 0x82e   :  { %2132 = vmatpush3.bf16.msra.mxu1 %v860_v48  ;;  %v1933_v48 = vld [vmem:[%s2973_s14] ss:$0 sm:$0xff] }
 0x82f   :  { %2151 = vmatprep.subr.bf16.mxu1 %v2343_v17 }
 0x8f4   :  { %v719_v56 = vpop.f32.mrb[16].mxu1 }
 0x8f5   :  { %v720_v57 = vadd.f32 %v1925_v55, %v719_v56  ;;  %v2115_v58 = vpop.f32.mrb[17].mxu1 }
 0x8f6   :  { %v722_v59 = vpop.f32.mrb[18].mxu1 }
 0x8f7   :  { %v723_v60 = vadd.f32 %v1925_v55, %v722_v59  ;;  %v2116_v61 = vpop.f32.mrb[19].mxu1  ;;  %v726_v50 = vadd.f32 %v720_v57, %v2494_v35 }
 0x8f9   :  { %v730_v47 = vsel %vm72_vm0, %v726_v50, 0.0  ;;  %v727_v63 = vadd.f32 %v723_v60, %v2496_v36  ;;  %v772_v36 = vld [vmem:[%s2969_s10] sm:$0xff] }
 0x8fa   :  { %731 = vadd.xlane.f32.xlu1 %v730_v47  ;;  %v777_v12 = vpack.c.bf16 %v773_v11, %v772_v36  ;;  %v1931_v36 = vld [vmem:[%s2972_s13] ss:$0 sm:$0xff] }
 0x8fb   :  { %v733_v0 = vsel %vm72_vm0, %v727_v63, 0.0 }
 0x8fc   :  { %734 = vadd.xlane.f32.xlu0 %v733_v0  ;;  %2118 = vmatpush3.bf16.msra.mxu0 %v777_v12 }
 0x8fd   :  { %2119 = vmatprep.subr.bf16.mxu0 %v2343_v17 }
 0x900   :  { %2120 = vmatpush3.bf16.msra.mxu0 %v778_v15 }
 0x901   :  { %2137 = vmatprep.subr.bf16.mxu0 %v2343_v17 }
 0x987   :  { %v732_v1 = vpop.xlane.xlu1 %731 }
 0x988   :  { %v736_v3 = vmul.f32 0.03125, %v732_v1 }
 0x989   :  { %v735_v4 = vpop.xlane.xlu0 %734 }
 0x98a   :  { %v738_v5 = vsub.f32 %v726_v50, %v736_v3  ;;  %v737_v6 = vmul.f32 0.03125, %v735_v4 }
 0x98c   :  { %v739_v7 = vsub.f32 %v727_v63, %v737_v6  ;;  %v740_v8 = vmul.f32 %v738_v5, %v738_v5 }
 0x98e   :  { %v742_v9 = vsel %vm72_vm0, %v740_v8, 0.0  ;;  %v741_v10 = vmul.f32 %v739_v7, %v739_v7 }
 0x98f   :  { %743 = vadd.xlane.f32.xlu0 %v742_v9 }
 0x990   :  { %v745_v35 = vsel %vm72_vm0, %v741_v10, 0.0 }
 0x993   :  { %746 = vadd.xlane.f32.xlu0 %v745_v35 }
 0xa1c   :  { %v744_v16 = vpop.xlane.xlu0 %743 }
 0xa1d   :  { %v748_v18 = vmul.f32 0.03125, %v744_v16 }
 0xa1f   :  { %v750_v46 = vadd.f32 1e-12, %v748_v18 }
 0xa20   :  { %v747_v19 = vpop.xlane.xlu0 %746 }
 0xa21   :  { %2277 = vrsqrt.f32 %v750_v46  ;;  %v749_v20 = vmul.f32 0.03125, %v747_v19 }
 0xa23   :  { %v751_v21 = vadd.f32 1e-12, %v749_v20 }
 0xa25   :  { %2279 = vrsqrt.f32 %v751_v21 }
 0xa2b   :  { %v2278_v22 = vpop.eup %2277 }
 0xa2c   :  { %v754_v23 = vmul.f32 %v2278_v22, %v738_v5 }
 0xa2e   :  { %v762_v26 = vmul.f32 %v1927_v24, %v754_v23 }
 0xa2f   :  { %v2280_v25 = vpop.eup %2279 }
 0xa30   :  { %v755_v27 = vmul.f32 %v2280_v25, %v739_v7  ;;  %v2646_v29 = vadd.f32 %v1928_v43, %v762_v26 }
 0xa32   :  { %v763_v28 = vmul.f32 %v1927_v24, %v755_v27 }
 0xa34   :  { %v2648_v30 = vadd.f32 %v1928_v43, %v763_v28 }
 0xa36   :  { %v776_v31 = vpack.c.bf16 %v2648_v30, %v2646_v29 }
 0xa38   :  { %2122 = vmatmul.mubr.msk.bf16.vlgmr.msra.gmra.mrb[20].mxu0 %vm72_vm0, %v776_v31  ;;  %v1936_v31 = vld [vmem:[%s2988_s26 + $0x28] sm:$0xff] }
 0xa39   :  { %2141 = vmatprep.mubr.msk.bf16.mxu0 %vm2344_vm1, %v2343_v17 }
 0xb0b   :  { %v823_v51 = vpop.f32.mrb[20].mxu0 }
 0xb0c   :  { %v824_v52 = vadd.f32 %v1929_v49, %v823_v51  ;;  %v2123_v53 = vpop.f32.mrb[21].mxu0 }
 0xb0d   :  { %v826_v54 = vpop.f32.mrb[22].mxu0 }
 0xb0e   :  { %v830_v55 = vmul.f32 %v824_v52, %v824_v52  ;;  %v827_v56 = vadd.f32 %v1929_v49, %v826_v54  ;;  %v2124_v57 = vpop.f32.mrb[23].mxu0  ;;  %v1934_v54 = vld [vmem:[%s2974_s15] ss:$0 sm:$0xff] }
 0xb10   :  { %v832_v58 = vmul.f32 %v830_v55, %v824_v52  ;;  %v831_v59 = vmul.f32 %v827_v56, %v827_v56 }
 0xb12   :  { %v834_v60 = vmul.f32 0.044715, %v832_v58  ;;  %v833_v61 = vmul.f32 %v831_v59, %v827_v56  ;;  %v1940_v59 = vld [vmem:[%s2964_s5 + $0x1] ss:$0 sm:$0xff] }
 0xb14   :  { %v836_v50 = vadd.f32 %v834_v60, %v824_v52  ;;  %v835_v47 = vmul.f32 0.044715, %v833_v61 }
 0xb16   :  { %v838_v63 = vmul.f32 0.7978846, %v836_v50  ;;  %v837_v0 = vadd.f32 %v835_v47, %v827_v56 }
 0xb18   :  { %2281 = vtanh.f32 %v838_v63  ;;  %v839_v1 = vmul.f32 0.7978846, %v837_v0 }
 0xb1a   :  { %2283 = vtanh.f32 %v839_v1 }
 0xb22   :  { %v2282_v3 = vpop.eup %2281 }
 0xb23   :  { %v842_v4 = vadd.f32 1.0, %v2282_v3 }
 0xb24   :  { %v2284_v5 = vpop.eup %2283 }
 0xb25   :  { %v844_v6 = vmul.f32 0.5, %v842_v4  ;;  %v843_v7 = vadd.f32 1.0, %v2284_v5 }
 0xb27   :  { %v845_v8 = vmul.f32 0.5, %v843_v7  ;;  %v846_v9 = vmul.f32 %v844_v6, %v824_v52 }
 0xb29   :  { %v847_v10 = vmul.f32 %v845_v8, %v827_v56 }
 0xb2b   :  { %v856_v35 = vpack.c.bf16 %v847_v10, %v846_v9 }
 0xb2d   :  { %2134 = vmatmul.mubr.msk.bf16.vlgmr.msra.gmra.mrb[20].mxu1 %vm868_vm5, %v856_v35 }
 0xb2e   :  { %2153 = vmatprep.mubr.msk.bf16.mxu1 %vm2344_vm1, %v2343_v17 }
 0xc00   :  { %v906_v11 = vpop.f32.mrb[20].mxu1 }
 0xc01   :  { %v907_v12 = vadd.f32 %v1931_v36, %v906_v11  ;;  %v2135_v13 = vpop.f32.mrb[21].mxu1 }
 0xc02   :  { %v909_v14 = vpop.f32.mrb[22].mxu1 }
 0xc03   :  { %v910_v15 = vadd.f32 %v1931_v36, %v909_v14  ;;  %v2136_v16 = vpop.f32.mrb[23].mxu1  ;;  %v913_v18 = vadd.f32 %v907_v12, %v2646_v29 }
 0xc05   :  { %v917_v46 = vsel %vm72_vm0, %v913_v18, 0.0  ;;  %v914_v19 = vadd.f32 %v910_v15, %v2648_v30  ;;  %v1935_v30 = vld [vmem:[%s2988_s26 + $0x20] sm:$0xff] }
 0xc06   :  { %918 = vadd.xlane.f32.xlu1 %v917_v46  ;;  %v965_v32 = vpack.c.bf16 %v1936_v31, %v1935_v30 }
 0xc07   :  { %v920_v20 = vsel %vm72_vm0, %v914_v19, 0.0 }
 0xc08   :  { %921 = vadd.xlane.f32.xlu0 %v920_v20  ;;  %2138 = vmatpush3.bf16.msra.mxu0 %v965_v32 }
 0xc09   :  { %2139 = vmatprep.subr.bf16.mxu0 %v2343_v17 }
 0xc0c   :  { %2140 = vmatpush3.bf16.msra.mxu0 %v966_v37 }
 0xc0d   :  { %2145 = vmatprep.subr.bf16.mxu0 %v2343_v17 }
 0xc93   :  { %v919_v21 = vpop.xlane.xlu1 %918 }
 0xc94   :  { %v923_v22 = vmul.f32 0.03125, %v919_v21 }
 0xc95   :  { %v922_v23 = vpop.xlane.xlu0 %921 }
 0xc96   :  { %v925_v24 = vsub.f32 %v913_v18, %v923_v22  ;;  %v924_v25 = vmul.f32 0.03125, %v922_v23 }
 0xc98   :  { %v926_v26 = vsub.f32 %v914_v19, %v924_v25  ;;  %v927_v27 = vmul.f32 %v925_v24, %v925_v24 }
 0xc9a   :  { %v929_v43 = vsel %vm72_vm0, %v927_v27, 0.0  ;;  %v928_v28 = vmul.f32 %v926_v26, %v926_v26 }
 0xc9b   :  { %930 = vadd.xlane.f32.xlu1 %v929_v43 }
 0xc9c   :  { %v932_v29 = vsel %vm72_vm0, %v928_v28, 0.0 }
 0xc9d   :  { %933 = vadd.xlane.f32.xlu0 %v932_v29 }
 0xd28   :  { %v931_v38 = vpop.xlane.xlu1 %930 }
 0xd29   :  { %v935_v39 = vmul.f32 0.03125, %v931_v38 }
 0xd2a   :  { %v934_v40 = vpop.xlane.xlu0 %933 }
 0xd2b   :  { %v937_v41 = vadd.f32 1e-12, %v935_v39  ;;  %v936_v42 = vmul.f32 0.03125, %v934_v40 }
 0xd2d   :  { %2285 = vrsqrt.f32 %v937_v41  ;;  %v938_v44 = vadd.f32 1e-12, %v936_v42 }
 0xd2f   :  { %2287 = vrsqrt.f32 %v938_v44 }
 0xd37   :  { %v2286_v45 = vpop.eup %2285 }
 0xd38   :  { %v941_v49 = vmul.f32 %v2286_v45, %v925_v24 }
 0xd39   :  { %v2288_v51 = vpop.eup %2287 }
 0xd3a   :  { %v949_v52 = vmul.f32 %v1933_v48, %v941_v49  ;;  %v942_v53 = vmul.f32 %v2288_v51, %v926_v26 }
 0xd3c   :  { %v950_v55 = vmul.f32 %v1933_v48, %v942_v53  ;;  %v2718_v56 = vadd.f32 %v1934_v54, %v949_v52 }
 0xd3e   :  { %v2720_v57 = vadd.f32 %v1934_v54, %v950_v55 }
 0xd40   :  { %v964_v58 = vpack.c.bf16 %v2720_v57, %v2718_v56 }
 0xd42   :  { %2142 = vmatmul.mubr.msk.bf16.vlgmr.msra.gmra.mrb[24].mxu0 %vm72_vm0, %v964_v58 }
 0xd43   :  { %2147 = vmatprep.mubr.msk.bf16.mxu0 %vm2344_vm1, %v2343_v17 }
 0xe15   :  { %v1012_v60 = vpop.f32.mrb[24].mxu0 }
 0xe16   :  { %v1013_v61 = vadd.f32 %v1940_v59, %v1012_v60  ;;  %v2143_v50 = vpop.f32.mrb[25].mxu0 }
 0xe17   :  { %v1015_v47 = vpop.f32.mrb[26].mxu0 }
 0xe18   :  { %v2730_v63 = vpack.c.bf16 %v1013_v61, %v1013_v61  ;;  %v1016_v0 = vadd.f32 %v1940_v59, %v1015_v47  ;;  %v2144_v1 = vpop.f32.mrb[27].mxu0 }
 0xe1a   :  { %v2732_v3 = vpack.c.bf16 %v1016_v0, %v1016_v0  ;;  %1022 = vrot.lane.b32.xlu1 %v2730_v63, %s2345_s27 }
 0xe1c   :  { %1071 = vrot.lane.b32.xlu0 %v2732_v3, %s2345_s27 }
 0xe8c   :  { %v1023_v4 = vpop.permute.xlu1 %1022 }
 0xe8d   :  { %v1028_v5 = vsel %vm179_vm2, %v1023_v4, 0 }
 0xe8e   :  { %2146 = vmatpush3.bf16.xpose.msra.mxu0 %v1028_v5  ;;  %v1072_v6 = vpop.permute.xlu0 %1071 }
 0xe8f   :  { %v1077_v7 = vsel %vm179_vm2, %v1072_v6, 0  ;;  %2157 = vmatprep.subr.bf16.mxu0 %v2343_v17 }
 0xe90   :  { %2152 = vmatpush3.bf16.xpose.msra.mxu1 %v1077_v7 }
 0xe91   :  { %2163 = vmatprep.subr.bf16.mxu1 %v2343_v17 }
 0xe95   :  { %2148 = vmatmul.mubr.msk.bf16.vlgmr.msra.gmra.mrb[28].mxu0 %vm179_vm2, %v2730_v63 }
 0xe96   :  { %2159 = vmatprep.mubr.msk.bf16.mxu0 %vm2344_vm1, %v2343_v17 }
 0xe97   :  { %2154 = vmatmul.mubr.msk.bf16.vlgmr.msra.gmra.mrb[24].mxu1 %vm179_vm2, %v2732_v3 }
 0xe98   :  { %2165 = vmatprep.mubr.msk.bf16.mxu1 %vm2344_vm1, %v2343_v17 }
 0xf68   :  { %v1064_v8 = vpop.f32.mrb[28].mxu0 }
 0xf69   :  { %v1119_v9 = vmul.f32 0.25, %v1064_v8  ;;  %v2149_v10 = vpop.f32.mrb[29].mxu0 }
 0xf6a   :  { %v1067_v35 = vpop.f32.mrb[30].mxu0  ;;  %v1113_v36 = vpop.f32.mrb[24].mxu1 }
 0xf6b   :  { %v1120_v11 = vmul.f32 0.25, %v1113_v36  ;;  %v2150_v12 = vpop.f32.mrb[31].mxu0  ;;  %v2155_v13 = vpop.f32.mrb[25].mxu1  ;;  %v1121_v14 = vadd.f32 %v1119_v9, %v2529_v62 }
 0xf6c   :  { %v1116_v15 = vpop.f32.mrb[26].mxu1 }
 0xf6d   :  { %v2156_v16 = vpop.f32.mrb[27].mxu1  ;;  %v1123_v18 = vsel %vm312_vm3, %v1121_v14, -inf  ;;  %v1122_v46 = vadd.f32 %v1120_v11, %v2531_v2 }
 0xf6e   :  { %1124 = vmax.xlane.f32.xlu1 %v1123_v18 }
 0xf6f   :  { %v1126_v19 = vsel %vm312_vm3, %v1122_v46, -inf }
 0xf70   :  { %1127 = vmax.xlane.f32.xlu0 %v1126_v19 }
 0xf7f   :  { %1147 = vrot.lane.b32.xlu1 %v2730_v63, %s2347_s30 }
 0xffb   :  { %v1125_v20 = vpop.xlane.xlu1 %1124 }
 0xffc   :  { %v1129_v21 = vsub.f32 %v1121_v14, %v1125_v20 }
 0xffd   :  { %v1128_v22 = vpop.xlane.xlu0 %1127 }
 0xffe   :  { %v1131_v23 = vmul.f32 1.442695, %v1129_v21  ;;  %v1130_v24 = vsub.f32 %v1122_v46, %v1128_v22 }
 0xfff   :  { %v1148_v25 = vpop.permute.xlu1 %1147 }
0x1000   :  { %2289 = vpow2.f32 %v1131_v23  ;;  %v1133_v26 = vmul.f32 1.442695, %v1130_v24  ;;  %v1153_v27 = vsel %vm342_vm4, %v1148_v25, 0 }
0x1001   :  { %2158 = vmatpush3.bf16.msra.mxu0 %v1153_v27 }
0x1002   :  { %2291 = vpow2.f32 %v1133_v26  ;;  %2169 = vmatprep.subr.bf16.mxu0 %v2343_v17 }
0x100a   :  { %v2290_v43 = vpop.eup %2289 }
0x100b   :  { %v1135_v28 = vsel %vm312_vm3, %v2290_v43, 0.0 }
0x100c   :  { %v2292_v29 = vpop.eup %2291  ;;  %1136 = vadd.xlane.f32.xlu1 %v1135_v28 }
0x100d   :  { %v1138_v30 = vsel %vm312_vm3, %v2292_v29, 0.0 }
0x100e   :  { %1139 = vadd.xlane.f32.xlu0 %v1138_v30  ;;  %v1950_v30 = vld [vmem:[%s2965_s6 + $0x20] sm:$0xff] }
0x101d   :  { %1245 = vrot.lane.b32.xlu1 %v2730_v63, %s2348_s0 }
0x1021   :  { %1295 = vrot.lane.b32.xlu1 %v2732_v3, %s2348_s0 }
0x1024   :  { %1195 = vrot.lane.b32.xlu0 %v2732_v3, %s2347_s30 }
0x1025   :  { %1243 = vrot.lane.b32.xlu1 %v2730_v63, %s2349_s21 }
0x1028   :  { %1293 = vrot.lane.b32.xlu0 %v2732_v3, %s2349_s21 }
0x1099   :  { %v1137_v31 = vpop.xlane.xlu1 %1136 }
0x109a   :  { %2293 = vrcp.f32 %v1137_v31  ;;  %v1951_v31 = vld [vmem:[%s2965_s6 + $0x28] sm:$0xff] }
0x109b   :  { %v1140_v32 = vpop.xlane.xlu0 %1139 }
0x109c   :  { %2295 = vrcp.f32 %v1140_v32  ;;  %v1483_v32 = vpack.c.bf16 %v1951_v31, %v1950_v30 }
0x109d   :  { %v1246_v37 = vpop.permute.xlu1 %1245 }
0x109e   :  { %v1251_v45 = vsel %vm179_vm2, %v1246_v37, 0 }
0x109f   :  { %v1196_v33 = vpop.permute.xlu0 %1195 }
0x10a0   :  { %v1201_v34 = vsel %vm342_vm4, %v1196_v33, 0  ;;  %v1952_v33 = vld [vmem:[%s2965_s6 + $0x30] sm:$0xff] }
0x10a1   :  { %2164 = vmatpush3.bf16.msra.mxu1 %v1201_v34  ;;  %v1296_v44 = vpop.permute.xlu1 %1295  ;;  %v1953_v34 = vld [vmem:[%s2965_s6 + $0x38] sm:$0xff] }
0x10a2   :  { %2175 = vmatprep.subr.bf16.mxu1 %v2343_v17  ;;  %v1301_v49 = vsel %vm179_vm2, %v1296_v44, 0  ;;  %v1484_v37 = vpack.c.bf16 %v1953_v34, %v1952_v33  ;;  %v1969_v33 = vld [vmem:[%s2971_s12 + $0x48] sm:$0xff] }
0x10a3   :  { %v1294_v52 = vpop.permute.xlu0 %1293 }
0x10a4   :  { %v2294_v38 = vpop.eup %2293 }
0x10a5   :  { %v1143_v39 = vmul.f32 %v2294_v38, %v2290_v43  ;;  %v1244_v51 = vpop.permute.xlu1 %1243 }
0x10a6   :  { %v2296_v40 = vpop.eup %2295 }
0x10a7   :  { %v1144_v41 = vmul.f32 %v2296_v40, %v2292_v29  ;;  %v1145_v42 = vpack.c.bf16 %v1143_v39, %v1143_v39 }
0x10a9   :  { %2160 = vmatmul.mubr.msk.bf16.vlgmr.msra.gmra.mrb[32].mxu0 %vm312_vm3, %v1145_v42  ;;  %v1146_v48 = vpack.c.bf16 %v1144_v41, %v1144_v41 }
0x10aa   :  { %2170 = vmatpush3.bf16.xpose.msra.mxu0 %v1251_v45  ;;  %2171 = vmatprep.mubr.msk.bf16.mxu0 %vm2344_vm1, %v2343_v17 }
0x10ab   :  { %2166 = vmatmul.mubr.msk.bf16.vlgmr.msra.gmra.mrb[28].mxu1 %vm312_vm3, %v1146_v48  ;;  %2181 = vmatprep.subr.bf16.mxu0 %v2343_v17 }
0x10ac   :  { %2176 = vmatpush3.bf16.xpose.msra.mxu1 %v1301_v49  ;;  %2177 = vmatprep.mubr.msk.bf16.mxu1 %vm2344_vm1, %v2343_v17 }
0x10ad   :  { %2187 = vmatprep.subr.bf16.mxu1 %v2343_v17 }
0x10b1   :  { %2172 = vmatmul.mubr.msk.bf16.vlgmr.msra.gmra.mrb[36].mxu0 %vm179_vm2, %v1244_v51 }
0x10b2   :  { %2183 = vmatprep.mubr.msk.bf16.mxu0 %vm2344_vm1, %v2343_v17 }
0x10b3   :  { %2178 = vmatmul.mubr.msk.bf16.vlgmr.msra.gmra.mrb[32].mxu1 %vm179_vm2, %v1294_v52 }
0x10b4   :  { %2189 = vmatprep.mubr.msk.bf16.mxu1 %vm2344_vm1, %v2343_v17 }
0x117c   :  { %v2788_v53 = vpop.f32.mrb[32].mxu0 }
0x117d   :  { %v2161_v54 = vpop.f32.mrb[33].mxu0 }
0x117e   :  { %v1192_v55 = vpop.f32.mrb[34].mxu0  ;;  %v2790_v58 = vpop.f32.mrb[28].mxu1 }
0x117f   :  { %v2162_v59 = vpop.f32.mrb[35].mxu0  ;;  %v2167_v60 = vpop.f32.mrb[29].mxu1 }
0x1180   :  { %v1240_v61 = vpop.f32.mrb[30].mxu1 }
0x1181   :  { %v2168_v50 = vpop.f32.mrb[31].mxu1  ;;  %v1955_v61 = vld [vmem:[%s2966_s7 + $0x1] ss:$0 sm:$0xff] }
0x1184   :  { %v1287_v47 = vpop.f32.mrb[36].mxu0 }
0x1185   :  { %v1343_v0 = vmul.f32 0.25, %v1287_v47  ;;  %v2173_v1 = vpop.f32.mrb[37].mxu0 }
0x1186   :  { %v1290_v4 = vpop.f32.mrb[38].mxu0  ;;  %v1337_v5 = vpop.f32.mrb[32].mxu1 }
0x1187   :  { %v1344_v6 = vmul.f32 0.25, %v1337_v5  ;;  %v2174_v7 = vpop.f32.mrb[39].mxu0  ;;  %v2179_v8 = vpop.f32.mrb[33].mxu1  ;;  %v1345_v9 = vadd.f32 %v1343_v0, %v2529_v62 }
0x1188   :  { %v1340_v10 = vpop.f32.mrb[34].mxu1 }
0x1189   :  { %v2180_v35 = vpop.f32.mrb[35].mxu1  ;;  %v1347_v36 = vsel %vm312_vm3, %v1345_v9, -inf  ;;  %v1346_v11 = vadd.f32 %v1344_v6, %v2531_v2 }
0x118a   :  { %1348 = vmax.xlane.f32.xlu1 %v1347_v36 }
0x118b   :  { %v1350_v12 = vsel %vm312_vm3, %v1346_v11, -inf }
0x118c   :  { %1351 = vmax.xlane.f32.xlu0 %v1350_v12 }
0x119b   :  { %1371 = vrot.lane.b32.xlu1 %v2730_v63, %s2350_s1 }
0x1217   :  { %v1349_v13 = vpop.xlane.xlu1 %1348 }
0x1218   :  { %v1353_v14 = vsub.f32 %v1345_v9, %v1349_v13 }
0x1219   :  { %v1352_v15 = vpop.xlane.xlu0 %1351 }
0x121a   :  { %v1355_v16 = vmul.f32 1.442695, %v1353_v14  ;;  %v1354_v18 = vsub.f32 %v1346_v11, %v1352_v15  ;;  %v1962_v15 = vld [vmem:[%s2969_s10 + $0x28] sm:$0xff] }
0x121b   :  { %v1372_v46 = vpop.permute.xlu1 %1371 }
0x121c   :  { %2297 = vpow2.f32 %v1355_v16  ;;  %v1357_v62 = vmul.f32 1.442695, %v1354_v18  ;;  %v1377_v19 = vsel %vm342_vm4, %v1372_v46, 0  ;;  %v1963_v18 = vld [vmem:[%s2969_s10 + $0x30] sm:$0xff]  ;;  %v1964_v46 = vld [vmem:[%s2969_s10 + $0x38] sm:$0xff] }
0x121d   :  { %2182 = vmatpush3.bf16.msra.mxu0 %v1377_v19 }
0x121e   :  { %2299 = vpow2.f32 %v1357_v62  ;;  %2193 = vmatprep.subr.bf16.mxu0 %v2343_v17  ;;  %v1592_v62 = vpack.c.bf16 %v1964_v46, %v1963_v18 }
0x1226   :  { %v2298_v2 = vpop.eup %2297 }
0x1227   :  { %v1359_v20 = vsel %vm312_vm3, %v2298_v2, 0.0 }
0x1228   :  { %v2300_v21 = vpop.eup %2299  ;;  %1360 = vadd.xlane.f32.xlu0 %v1359_v20 }
0x1229   :  { %v1362_v63 = vsel %vm312_vm3, %v2300_v21, 0.0 }
0x122c   :  { %1363 = vadd.xlane.f32.xlu0 %v1362_v63 }
0x1242   :  { %1419 = vrot.lane.b32.xlu0 %v2732_v3, %s2350_s1 }
0x12b5   :  { %v1361_v22 = vpop.xlane.xlu0 %1360 }
0x12b6   :  { %2301 = vrcp.f32 %v1361_v22 }
0x12b9   :  { %v1364_v23 = vpop.xlane.xlu0 %1363 }
0x12ba   :  { %2303 = vrcp.f32 %v1364_v23 }
0x12bd   :  { %v1420_v24 = vpop.permute.xlu0 %1419 }
0x12be   :  { %v1425_v25 = vsel %vm342_vm4, %v1420_v24, 0  ;;  %v1959_v24 = vld [vmem:[%s2967_s8 + $0x1] ss:$0 sm:$0xff] }
0x12bf   :  { %2188 = vmatpush3.bf16.msra.mxu1 %v1425_v25 }
0x12c0   :  { %v2302_v26 = vpop.eup %2301  ;;  %2201 = vmatprep.subr.bf16.mxu1 %v2343_v17 }
0x12c1   :  { %v1367_v27 = vmul.f32 %v2302_v26, %v2298_v2 }
0x12c3   :  { %v1369_v43 = vpack.c.bf16 %v1367_v27, %v1367_v27 }
0x12c4   :  { %v2304_v28 = vpop.eup %2303 }
0x12c5   :  { %v1368_v29 = vmul.f32 %v2304_v28, %v2300_v21  ;;  %2184 = vmatmul.mubr.msk.bf16.vlgmr.msra.gmra.mrb[40].mxu0 %vm312_vm3, %v1369_v43  ;;  %v1960_v28 = vld [vmem:[%s2968_s9 + $0x1] ss:$0 sm:$0xff] }
0x12c6   :  { %2197 = vmatprep.mubr.msk.bf16.mxu0 %vm2344_vm1, %v2343_v17  ;;  %2194 = vmatpush3.bf16.msra.mxu0 %v1483_v32  ;;  %v1968_v32 = vld [vmem:[%s2971_s12 + $0x40] sm:$0xff] }
0x12c7   :  { %v1370_v3 = vpack.c.bf16 %v1368_v29, %v1368_v29  ;;  %2195 = vmatprep.subr.bf16.mxu0 %v2343_v17  ;;  %v1673_v34 = vpack.c.bf16 %v1969_v33, %v1968_v32  ;;  %v1785_v32 = vld [vmem:[%s2975_s16 + $0x18] sm:$0xff] }
0x12c9   :  { %2190 = vmatmul.mubr.msk.bf16.vlgmr.msra.gmra.mrb[36].mxu1 %vm312_vm3, %v1370_v3 }
0x12ca   :  { %2205 = vmatprep.mubr.msk.bf16.mxu1 %vm2344_vm1, %v2343_v17  ;;  %2196 = vmatpush3.bf16.msra.mxu0 %v1484_v37  ;;  %v1970_v37 = vld [vmem:[%s2971_s12 + $0x50] sm:$0xff] }
0x12cb   :  { %2209 = vmatprep.subr.bf16.mxu0 %v2343_v17 }
0x1398   :  { %v1413_v38 = vpop.f32.mrb[40].mxu0 }
0x1399   :  { %v2185_v39 = vpop.f32.mrb[41].mxu0 }
0x139a   :  { %v1416_v40 = vpop.f32.mrb[42].mxu0 }
0x139b   :  { %v2186_v41 = vpop.f32.mrb[43].mxu0  ;;  %v1972_v40 = vld [vmem:[%s2971_s12 + $0x60] sm:$0xff] }
0x139c   :  { %v1461_v42 = vpop.f32.mrb[36].mxu1  ;;  %v1973_v41 = vld [vmem:[%s2971_s12 + $0x68] sm:$0xff] }
0x139d   :  { %v2252_v44 = vpack.i.bf16 %v1461_v42, %v1413_v38  ;;  %v2191_v45 = vpop.f32.mrb[37].mxu1  ;;  %v1971_v38 = vld [vmem:[%s2971_s12 + $0x58] sm:$0xff]  ;;  %v1675_v42 = vpack.c.bf16 %v1973_v41, %v1972_v40 }
0x139e   :  { %v1464_v48 = vpop.f32.mrb[38].mxu1  ;;  %v1674_v39 = vpack.c.bf16 %v1971_v38, %v1970_v37  ;;  %v1975_v45 = vld [vmem:[%s2971_s12 + $0x78] sm:$0xff] }
0x139f   :  { %2253 = vrot.lane.b32.xlu1 %v2252_v44, %s2351_s29  ;;  %v2192_v49 = vpop.f32.mrb[39].mxu1  ;;  %v1974_v44 = vld [vmem:[%s2971_s12 + $0x70] sm:$0xff] }
0x13a0   :  { %v1676_v48 = vpack.c.bf16 %v1975_v45, %v1974_v44  ;;  %v1966_v49 = vld [vmem:[%s2970_s11 + $0x1] ss:$0 sm:$0xff] }
0x1411   :  { %v2254_v51 = vpop.permute.xlu1 %2253 }
0x1412   :  { %v2256_v52 = vunpack.i.h.bf16 %v2254_v51  ;;  %v2255_v54 = vunpack.i.l.bf16 %v2254_v51 }
0x1414   :  { %v1476_v55 = vsel %vm179_vm2, %v2790_v58, %v2256_v52  ;;  %v1475_v59 = vsel %vm179_vm2, %v2788_v53, %v2255_v54 }
0x1415   :  { %v1482_v60 = vpack.c.bf16 %v1476_v55, %v1475_v59 }
0x1417   :  { %2198 = vmatmul.mubr.msk.bf16.vlgmr.msra.gmra.mrb[44].mxu0 %vm72_vm0, %v1482_v60 }
0x1418   :  { %2217 = vmatprep.mubr.msk.bf16.mxu0 %vm2344_vm1, %v2343_v17  ;;  %2210 = vmatpush3.bf16.msra.mxu0 %v1673_v34 }
0x1419   :  { %2211 = vmatprep.subr.bf16.mxu0 %v2343_v17 }
0x141c   :  { %2212 = vmatpush3.bf16.msra.mxu0 %v1674_v39 }
0x141d   :  { %2213 = vmatprep.subr.bf16.mxu0 %v2343_v17 }
0x1420   :  { %2214 = vmatpush3.bf16.msra.mxu0 %v1675_v42 }
0x1421   :  { %2215 = vmatprep.subr.bf16.mxu0 %v2343_v17 }
0x1424   :  { %2216 = vmatpush3.bf16.msra.mxu0 %v1676_v48  ;;  %v1981_v48 = vld [vmem:[%s2973_s14 + $0x1] ss:$0 sm:$0xff] }
0x14ea   :  { %v1530_v50 = vpop.f32.mrb[44].mxu0 }
0x14eb   :  { %v1531_v47 = vadd.f32 %v1955_v61, %v1530_v50  ;;  %v2199_v0 = vpop.f32.mrb[45].mxu0 }
0x14ec   :  { %v1533_v1 = vpop.f32.mrb[46].mxu0 }
0x14ed   :  { %v1534_v4 = vadd.f32 %v1955_v61, %v1533_v1  ;;  %v2200_v5 = vpop.f32.mrb[47].mxu0  ;;  %v1537_v58 = vadd.f32 %v1531_v47, %v2718_v56 }
0x14ef   :  { %v1543_v53 = vsel %vm72_vm0, %v1537_v58, 0.0  ;;  %v1538_v6 = vadd.f32 %v1534_v4, %v2720_v57  ;;  %v1961_v57 = vld [vmem:[%s2969_s10 + $0x20] sm:$0xff] }
0x14f0   :  { %1544 = vadd.xlane.f32.xlu1 %v1543_v53  ;;  %v1591_v16 = vpack.c.bf16 %v1962_v15, %v1961_v57 }
0x14f1   :  { %v1546_v7 = vsel %vm72_vm0, %v1538_v6, 0.0 }
0x14f2   :  { %1547 = vadd.xlane.f32.xlu0 %v1546_v7  ;;  %2202 = vmatpush3.bf16.msra.mxu1 %v1591_v16 }
0x14f3   :  { %2203 = vmatprep.subr.bf16.mxu1 %v2343_v17 }
0x14f6   :  { %2204 = vmatpush3.bf16.msra.mxu1 %v1592_v62 }
0x14f7   :  { %2221 = vmatprep.subr.bf16.mxu1 %v2343_v17 }
0x157d   :  { %v1545_v8 = vpop.xlane.xlu1 %1544 }
0x157e   :  { %v1549_v9 = vmul.f32 0.03125, %v1545_v8 }
0x157f   :  { %v1548_v10 = vpop.xlane.xlu0 %1547 }
0x1580   :  { %v1551_v35 = vsub.f32 %v1537_v58, %v1549_v9  ;;  %v1550_v36 = vmul.f32 0.03125, %v1548_v10 }
0x1582   :  { %v1552_v11 = vsub.f32 %v1538_v6, %v1550_v36  ;;  %v1553_v12 = vmul.f32 %v1551_v35, %v1551_v35 }
0x1584   :  { %v1555_v13 = vsel %vm72_vm0, %v1553_v12, 0.0  ;;  %v1554_v14 = vmul.f32 %v1552_v11, %v1552_v11 }
0x1585   :  { %1556 = vadd.xlane.f32.xlu0 %v1555_v13 }
0x1586   :  { %v1558_v56 = vsel %vm72_vm0, %v1554_v14, 0.0  ;;  %v1977_v14 = vld [vmem:[%s2972_s13 + $0x1] ss:$0 sm:$0xff] }
0x1587   :  { %1559 = vadd.xlane.f32.xlu1 %v1558_v56 }
0x1612   :  { %v1557_v19 = vpop.xlane.xlu0 %1556 }
0x1613   :  { %v1561_v2 = vmul.f32 0.03125, %v1557_v19 }
0x1614   :  { %v1560_v20 = vpop.xlane.xlu1 %1559 }
0x1615   :  { %v1563_v21 = vadd.f32 1e-12, %v1561_v2  ;;  %v1562_v63 = vmul.f32 0.03125, %v1560_v20 }
0x1617   :  { %2305 = vrsqrt.f32 %v1563_v21  ;;  %v1564_v22 = vadd.f32 1e-12, %v1562_v63 }
0x1619   :  { %2307 = vrsqrt.f32 %v1564_v22 }
0x1621   :  { %v2306_v23 = vpop.eup %2305 }
0x1622   :  { %v1567_v25 = vmul.f32 %v2306_v23, %v1551_v35 }
0x1623   :  { %v2308_v26 = vpop.eup %2307 }
0x1624   :  { %v1575_v27 = vmul.f32 %v1959_v24, %v1567_v25  ;;  %v1568_v43 = vmul.f32 %v2308_v26, %v1552_v11 }
0x1626   :  { %v1576_v29 = vmul.f32 %v1959_v24, %v1568_v43  ;;  %v1583_v3 = vadd.f32 %v1960_v28, %v1575_v27 }
0x1628   :  { %v1584_v30 = vadd.f32 %v1960_v28, %v1576_v29  ;;  %v1782_v29 = vld [vmem:[%s2975_s16] sm:$0xff] }
0x162a   :  { %v1590_v31 = vpack.c.bf16 %v1584_v30, %v1583_v3 }
0x162c   :  { %2206 = vmatmul.mubr.msk.bf16.vlgmr.msra.gmra.mrb[40].mxu1 %vm72_vm0, %v1590_v31  ;;  %v1784_v31 = vld [vmem:[%s2975_s16 + $0x10] sm:$0xff] }
0x162d   :  { %2225 = vmatprep.mubr.msk.bf16.mxu1 %vm2344_vm1, %v2343_v17  ;;  %v1788_v33 = vpack.c.bf16 %v1785_v32, %v1784_v31 }
0x16ff   :  { %v1638_v51 = vpop.f32.mrb[40].mxu1 }
0x1700   :  { %v1639_v52 = vadd.f32 %v1966_v49, %v1638_v51  ;;  %v2207_v54 = vpop.f32.mrb[41].mxu1 }
0x1701   :  { %v1641_v55 = vpop.f32.mrb[42].mxu1  ;;  %v1982_v54 = vld [vmem:[%s2974_s15 + $0x1] ss:$0 sm:$0xff] }
0x1702   :  { %v1645_v59 = vmul.f32 %v1639_v52, %v1639_v52  ;;  %v1642_v60 = vadd.f32 %v1966_v49, %v1641_v55  ;;  %v2208_v61 = vpop.f32.mrb[43].mxu1 }
0x1704   :  { %v1647_v50 = vmul.f32 %v1645_v59, %v1639_v52  ;;  %v1646_v47 = vmul.f32 %v1642_v60, %v1642_v60 }
0x1706   :  { %v1649_v0 = vmul.f32 0.044715, %v1647_v50  ;;  %v1648_v1 = vmul.f32 %v1646_v47, %v1642_v60  ;;  %v1840_v47 = vld [vmem:[%s2977_s18] sm:$0xff] }
0x1708   :  { %v1651_v4 = vadd.f32 %v1649_v0, %v1639_v52  ;;  %v1650_v5 = vmul.f32 0.044715, %v1648_v1  ;;  %v1841_v0 = vld [vmem:[%s2977_s18 + $0x8] sm:$0xff] }
0x1709   :  { %v1845_v1 = vpack.c.bf16 %v1841_v0, %v1840_v47 }
0x170a   :  { %v1653_v58 = vmul.f32 0.7978846, %v1651_v4  ;;  %v1652_v53 = vadd.f32 %v1650_v5, %v1642_v60  ;;  %v1842_v4 = vld [vmem:[%s2977_s18 + $0x10] sm:$0xff]  ;;  %v1843_v5 = vld [vmem:[%s2977_s18 + $0x18] sm:$0xff]  ;;  %s2352_s18 = smov [#allocation2]  }
0x170b   :  { %s1904_s5 = sshll.u32 %s2352_s18, 4  ;;  %s1905_s5 = int_to_ptr.vmem [resolvable:$true] %s1904_s5 }
0x170c   :  { %2309 = vtanh.f32 %v1653_v58  ;;  %v1654_v6 = vmul.f32 0.7978846, %v1652_v53  ;;  %v1846_v58 = vpack.c.bf16 %v1843_v5, %v1842_v4  ;;  %v1983_v53 = vld [vmem:[%s2976_s17] ss:$0 sm:$0xff]  ;;  %s2319_s17 = scalar_lea.vmem %s1905_s5, 32  ;;  %p2324_p1 = scmp.lt.s32.totalorder %s1905_s5, %s1905_s5 }
0x170d   :  { %p2320_p0 = scmp.ne.s32.totalorder %s1905_s5, %s2319_s17  ;;  %p2325_p2 = scmp.lt.s32.totalorder %s2319_s17, %s2319_s17 }
0x170e   :  { %2311 = vtanh.f32 %v1654_v6 }
0x170f   :  { %p2326_p3 = por %p2325_p2, %p2324_p1 }
0x1711   :  { %p2327_p4 = pnand %p2326_p3, %p2320_p0 }
0x1716   :  { %v2310_v7 = vpop.eup %2309 }
0x1717   :  { %v1657_v8 = vadd.f32 1.0, %v2310_v7 }
0x1718   :  { %v2312_v9 = vpop.eup %2311 }
0x1719   :  { %v1659_v10 = vmul.f32 0.5, %v1657_v8  ;;  %v1658_v35 = vadd.f32 1.0, %v2312_v9 }
0x171b   :  { %v1660_v36 = vmul.f32 0.5, %v1658_v35  ;;  %v1661_v11 = vmul.f32 %v1659_v10, %v1639_v52 }
0x171d   :  { %v1662_v12 = vmul.f32 %v1660_v36, %v1642_v60  ;;  %v1985_v36 = vld [vmem:[%s2978_s19] ss:$0 sm:$0xff] }
0x171f   :  { %v1672_v13 = vpack.c.bf16 %v1662_v12, %v1661_v11 }
0x1721   :  { %2218 = vmatmul.mubr.msk.bf16.vlgmr.msra.gmra.mrb[48].mxu0 %vm868_vm5, %v1672_v13 }
0x17f4   :  { %v1722_v56 = vpop.f32.mrb[48].mxu0 }
0x17f5   :  { %v1723_v57 = vadd.f32 %v1977_v14, %v1722_v56  ;;  %v2219_v15 = vpop.f32.mrb[49].mxu0 }
0x17f6   :  { %v1725_v16 = vpop.f32.mrb[50].mxu0 }
0x17f7   :  { %v1726_v18 = vadd.f32 %v1977_v14, %v1725_v16  ;;  %v2220_v46 = vpop.f32.mrb[51].mxu0  ;;  %v1729_v62 = vadd.f32 %v1723_v57, %v1583_v3  ;;  %v1783_v3 = vld [vmem:[%s2975_s16 + $0x8] sm:$0xff] }
0x17f9   :  { %v1735_v19 = vsel %vm72_vm0, %v1729_v62, 0.0  ;;  %v1730_v2 = vadd.f32 %v1726_v18, %v1584_v30  ;;  %v1787_v30 = vpack.c.bf16 %v1783_v3, %v1782_v29 }
0x17fa   :  { %1736 = vadd.xlane.f32.xlu1 %v1735_v19 }
0x17fb   :  { %v1738_v20 = vsel %vm72_vm0, %v1730_v2, 0.0  ;;  %2222 = vmatpush3.bf16.msra.mxu1 %v1787_v30 }
0x17fc   :  { %1739 = vadd.xlane.f32.xlu0 %v1738_v20  ;;  %2223 = vmatprep.subr.bf16.mxu1 %v2343_v17 }
0x17ff   :  { %2224 = vmatpush3.bf16.msra.mxu1 %v1788_v33 }
0x1800   :  { %2229 = vmatprep.subr.bf16.mxu1 %v2343_v17 }
0x1887   :  { %v1737_v21 = vpop.xlane.xlu1 %1736 }
0x1888   :  { %v1741_v63 = vmul.f32 0.03125, %v1737_v21 }
0x1889   :  { %v1740_v22 = vpop.xlane.xlu0 %1739 }
0x188a   :  { %v1743_v23 = vsub.f32 %v1729_v62, %v1741_v63  ;;  %v1742_v24 = vmul.f32 0.03125, %v1740_v22 }
0x188c   :  { %v1744_v25 = vsub.f32 %v1730_v2, %v1742_v24  ;;  %v1745_v26 = vmul.f32 %v1743_v23, %v1743_v23 }
0x188e   :  { %v1747_v27 = vsel %vm72_vm0, %v1745_v26, 0.0  ;;  %v1746_v43 = vmul.f32 %v1744_v25, %v1744_v25 }
0x188f   :  { %1748 = vadd.xlane.f32.xlu1 %v1747_v27 }
0x1890   :  { %v1750_v28 = vsel %vm72_vm0, %v1746_v43, 0.0 }
0x1891   :  { %1751 = vadd.xlane.f32.xlu0 %v1750_v28 }
0x191c   :  { %v1749_v34 = vpop.xlane.xlu1 %1748 }
0x191d   :  { %v1753_v37 = vmul.f32 0.03125, %v1749_v34 }
0x191e   :  { %v1752_v38 = vpop.xlane.xlu0 %1751 }
0x191f   :  { %v1755_v39 = vadd.f32 1e-12, %v1753_v37  ;;  %v1754_v40 = vmul.f32 0.03125, %v1752_v38 }
0x1921   :  { %2313 = vrsqrt.f32 %v1755_v39  ;;  %v1756_v41 = vadd.f32 1e-12, %v1754_v40 }
0x1923   :  { %2315 = vrsqrt.f32 %v1756_v41 }
0x192b   :  { %v2314_v42 = vpop.eup %2313 }
0x192c   :  { %v1759_v44 = vmul.f32 %v2314_v42, %v1743_v23 }
0x192d   :  { %v2316_v45 = vpop.eup %2315 }
0x192e   :  { %v1760_v49 = vmul.f32 %v2316_v45, %v1744_v25  ;;  %v1767_v51 = vmul.f32 %v1981_v48, %v1759_v44 }
0x1930   :  { %v1768_v52 = vmul.f32 %v1981_v48, %v1760_v49  ;;  %v1775_v59 = vadd.f32 %v1982_v54, %v1767_v51 }
0x1932   :  { %v1776_v55 = vadd.f32 %v1982_v54, %v1768_v52 }
0x1934   :  { %v1778_v60 = vrot.slane %v1776_v55, 7 }
0x1936   :  { %v1781_v61 = vsel %vm1780_vm6, %v1775_v59, %v1778_v60 }
0x1937   :  { %v1786_v50 = vpack.c.bf16 %v1781_v61, %v1781_v61 }
0x1939   :  { %2226 = vmatmul.mubr.msk.bf16.vlgmr.msra.gmra.mrb[44].mxu1 %vm72_vm0, %v1786_v50 }
0x193a   :  { %2233 = vmatprep.mubr.msk.bf16.mxu1 %vm2344_vm1, %v2343_v17  ;;  %2230 = vmatpush3.bf16.msra.mxu1 %v1845_v1 }
0x193b   :  { %2231 = vmatprep.subr.bf16.mxu1 %v2343_v17 }
0x193e   :  { %2232 = vmatpush3.bf16.msra.mxu1 %v1846_v58 }
0x1a0c   :  { %v1833_v6 = vpop.f32.mrb[44].mxu1 }
0x1a0d   :  { %v1834_v7 = vadd.f32 %v1983_v53, %v1833_v6  ;;  %v2227_v8 = vpop.f32.mrb[45].mxu1 }
0x1a0e   :  { %v1836_v9 = vpop.f32.mrb[46].mxu1 }
0x1a0f   :  { %2317 = vtanh.f32 %v1834_v7  ;;  %v2228_v17 = vpop.f32.mrb[47].mxu1 }
0x1a19   :  { %v2318_v10 = vpop.eup %2317 }
0x1a1a   :  { %v1844_v35 = vpack.c.bf16 %v2318_v10, %v2318_v10 }
0x1a1c   :  { %2234 = vmatmul.mubr.msk.bf16.vlgmr.msra.gmra.mrb[48].mxu1 %vm72_vm0, %v1844_v35 }
0x1aef   :  { %v1891_v11 = vpop.f32.mrb[48].mxu1 }
0x1af0   :  { %v1892_v12 = vadd.f32 %v1985_v36, %v1891_v11  ;;  %v2235_v13 = vpop.f32.mrb[49].mxu1 }
0x1af1   :  { %v1894_v14 = vpop.f32.mrb[50].mxu1 }
0x1af2   :  { %1897 = vst [vmem:[#allocation2] sm:$0x3] %v1892_v12  ;;  %v2236_v56 = vpop.f32.mrb[51].mxu1 }
0x1af3   :  { %2330 = shalt.err (!%p2327_p4)
}
0x1af4   :  { %s2331_s19 = scalar_lea.hbm %s2979_s20, 32 }
0x1af5   :  { %p2332_p5 = scmp.ne.s32.totalorder %s2979_s20, %s2331_s19  ;;  %p2335_p6 = scmp.lt.u32.totalorder %s2331_s19, %s2979_s20 }
0x1af7   :  { %p2337_p7 = pnand %p2335_p6, %p2332_p5 }
0x1af9   :  { %2340 = shalt.err (!%p2337_p7)
}
0x1afa   :  { %1907 = dma.vmem_to_hbm [thread:$0]  %s1905_s5, 32, %s2979_s20, [#allocation3]  }
0x1afb   :  { %2341 = dma.done.wait [#allocation3], 32  }
0x1afc   :  { %2342 = vsyncadd [#allocation3], 4294967264 }
0x1afd   :  { %1911 = vsyncpa [#allocation3], 1 }

</bundles_post_ra>
